<compile_context>
chip_gen: v7x
topology: tpu7x:2x2x1
jax: 0.10.0
libtpu: 0.0.40
codegen_flags: <defaults>
</compile_context>

<pallas_src>
import functools

import jax
import jax.numpy as jnp
from jax import lax
from jax.experimental import pallas as pl
from jax.experimental.pallas import tpu as pltpu

LN_EPS = 1e-5  # torch.nn.LayerNorm default


# ----------------------------- in-kernel helpers -----------------------------

def _layernorm(x, w, b):
    # x: (T, D) f32; w, b: (1, D) f32
    mu = jnp.mean(x, axis=-1, keepdims=True)
    var = jnp.mean((x - mu) ** 2, axis=-1, keepdims=True)
    return (x - mu) * lax.rsqrt(var + LN_EPS) * w + b


def _erf(x):
    # Abramowitz & Stegun 7.1.26 polynomial approximation (max abs err ~1.5e-7).
    a1, a2, a3, a4, a5 = 0.254829592, -0.284496736, 1.421413741, -1.453152027, 1.061405429
    p = 0.3275911
    ax = jnp.abs(x)
    t = 1.0 / (1.0 + p * ax)
    poly = ((((a5 * t + a4) * t + a3) * t + a2) * t + a1) * t
    y = 1.0 - poly * jnp.exp(-ax * ax)
    return jnp.where(x >= 0.0, y, -y)


def _gelu_exact(x):
    # nn.GELU() default = exact erf-based GELU (f32 math).
    return 0.5 * x * (1.0 + _erf(x * 0.7071067811865476))


# ------------------------------- Pallas kernel --------------------------------

def transformer_block_kernel(
    x_ref, ln1w_ref, ln1b_ref, wqkv_ref, wo_ref,
    ln2w_ref, ln2b_ref, w1_ref, b1_ref, w2_ref, b2_ref, o_ref, *, heads,
):
    cdt = wqkv_ref.dtype               # matmul operand dtype (bf16)
    x = x_ref[0]                       # (T, D) f32
    T, D = x.shape
    dh = D // heads

    # ---- prenorm MHSA: y = W_o(softmax(q k^T / sqrt(dh)) v) + x ----
    xn = _layernorm(x, ln1w_ref[...], ln1b_ref[...])

    # Fused QKV projection; 1/sqrt(dh) already folded into the W_q columns.
    qkv = jnp.dot(xn.astype(cdt), wqkv_ref[...],
                  preferred_element_type=jnp.float32)          # (T, 3D) f32

    # One reshape/transpose per operand -> (H, T, dh); heads batched on the MXU.
    q = qkv[:, 0 * D:1 * D].reshape(T, heads, dh).transpose(1, 0, 2).astype(cdt)
    k = qkv[:, 1 * D:2 * D].reshape(T, heads, dh).transpose(1, 0, 2).astype(cdt)
    v = qkv[:, 2 * D:3 * D].reshape(T, heads, dh).transpose(1, 0, 2).astype(cdt)

    s = jnp.einsum('hqd,hkd->hqk', q, k,
                   preferred_element_type=jnp.float32)          # (H, T, T) f32
    s = s - jnp.max(s, axis=-1, keepdims=True)                  # numerical stability
    p = jnp.exp(s)                                              # f32 (EUP)
    p = p * pl.reciprocal(jnp.sum(p, axis=-1, keepdims=True), approx=True)

    o_h = jnp.einsum('hqk,hkd->hqd', p.astype(cdt), v,
                     preferred_element_type=jnp.float32)        # (H, T, dh) f32
    heads_cat = o_h.transpose(1, 0, 2).reshape(T, D)            # concat heads once
    attn = jnp.dot(heads_cat.astype(cdt), wo_ref[...],
                   preferred_element_type=jnp.float32)          # single K=D matmul

    y = attn + x                      # dropout is identity at inference

    # ---- prenorm MLP: out = Linear2(GELU(Linear1(LN(y)))) + y ----
    yn = _layernorm(y, ln2w_ref[...], ln2b_ref[...])
    h1 = jnp.dot(yn.astype(cdt), w1_ref[...],
                 preferred_element_type=jnp.float32) + b1_ref[...]
    h1 = _gelu_exact(h1)                                        # f32
    h2 = jnp.dot(h1.astype(cdt), w2_ref[...],
                 preferred_element_type=jnp.float32) + b2_ref[...]

    o_ref[0] = (h2 + y).astype(o_ref.dtype)


# ------------------------------ python wrappers --------------------------------

def prep_block_params(p, *, heads, compute_dtype=jnp.bfloat16):
    """Fuse QKV, fold attention scale into W_q, cast matmul weights to bf16."""
    D = p["wq"].shape[0]
    assert D % heads == 0, "embed_dim must be divisible by num_heads"
    dh = D // heads
    scale = 1.0 / (dh ** 0.5)
    wqkv = jnp.concatenate([p["wq"] * scale, p["wk"], p["wv"]], axis=1)
    return dict(
        ln1_w=p["ln1_w"].astype(jnp.float32)[None, :],
        ln1_b=p["ln1_b"].astype(jnp.float32)[None, :],
        wqkv=wqkv.astype(compute_dtype),
        wo=p["wo"].astype(compute_dtype),
        ln2_w=p["ln2_w"].astype(jnp.float32)[None, :],
        ln2_b=p["ln2_b"].astype(jnp.float32)[None, :],
        w1=p["w1"].astype(compute_dtype),
        b1=p["b1"].astype(jnp.float32)[None, :],
        w2=p["w2"].astype(compute_dtype),
        b2=p["b2"].astype(jnp.float32)[None, :],
    )


def transformer_block(x, pp, *, heads):
    B, T, D = x.shape
    F = pp["w1"].shape[1]

    def rep_spec(shape):
        n = len(shape)
        return pl.BlockSpec(shape, lambda b, _n=n: (0,) * _n)   # grid-invariant

    in_specs = [
        pl.BlockSpec((1, T, D), lambda b: (b, 0, 0)),           # x
        rep_spec((1, D)), rep_spec((1, D)),                     # ln1 w, b
        rep_spec((D, 3 * D)),                                   # fused wqkv (bf16)
        rep_spec((D, D)),                                       # wo (bf16)
        rep_spec((1, D)), rep_spec((1, D)),                     # ln2 w, b
        rep_spec((D, F)), rep_spec((1, F)),                     # w1 (bf16), b1
        rep_spec((F, D)), rep_spec((1, D)),                     # w2 (bf16), b2
    ]

    weight_names = ("ln1_w", "ln1_b", "wqkv", "wo", "ln2_w", "ln2_b",
                    "w1", "b1", "w2", "b2")

    def nbytes(a):
        return int(a.size) * a.dtype.itemsize

    weight_bytes = sum(nbytes(pp[k]) for k in weight_names)
    x_block_bytes = T * D * x.dtype.itemsize
    # inputs + output are double-buffered by the Pallas pipeline
    est = 2 * weight_bytes + 4 * x_block_bytes
    vmem_limit = int(min(64 << 20, max(32 << 20, int(1.5 * est) + (8 << 20))))

    # Advisory cost so XLA schedules around the custom call sensibly.
    cost = pl.CostEstimate(
        flops=int(B * (2 * T * D * 3 * D          # fused QKV
                       + 4 * T * T * D            # q k^T and p v
                       + 2 * T * D * D            # W_o
                       + 4 * T * D * F)),         # MLP
        transcendentals=int(B * (heads * T * T + T * F)),
        bytes_accessed=int(2 * B * x_block_bytes + weight_bytes),
    )

    return pl.pallas_call(
        functools.partial(transformer_block_kernel, heads=heads),
        out_shape=jax.ShapeDtypeStruct((B, T, D), x.dtype),
        grid=(B,),
        in_specs=in_specs,
        out_specs=pl.BlockSpec((1, T, D), lambda b: (b, 0, 0)),
        compiler_params=pltpu.CompilerParams(
            dimension_semantics=("parallel",),
            vmem_limit_bytes=vmem_limit),
        cost_estimate=cost,
    )(
        x,
        pp["ln1_w"], pp["ln1_b"],
        pp["wqkv"], pp["wo"],
        pp["ln2_w"], pp["ln2_b"],
        pp["w1"], pp["b1"],
        pp["w2"], pp["b2"],
    )


@functools.partial(jax.jit, static_argnames=("heads", "extract_layers", "compute_dtype"))
def transformer_encoder(x, layer_params, *, heads, extract_layers,
                        compute_dtype=jnp.bfloat16):
    """Mirrors TransformerEncoder.forward: returns list of extracted layer outputs."""
    extracted = []
    for depth, p in enumerate(layer_params):
        pp = prep_block_params(p, heads=heads, compute_dtype=compute_dtype)
        x = transformer_block(x, pp, heads=heads)
        if depth + 1 in extract_layers:
            extracted.append(x)
    return extracted


# ------------------------------ pure-JAX references ------------------------------

def _ln_ref(v, w, b):
    mu = jnp.mean(v, axis=-1, keepdims=True)
    var = jnp.mean((v - mu) ** 2, axis=-1, keepdims=True)
    return (v - mu) * lax.rsqrt(var + LN_EPS) * w + b


def _block_ref_f32(x, p, heads):
    """Exact fp32 reference — mirrors the PyTorch module."""
    B, T, D = x.shape
    dh = D // heads
    xn = _ln_ref(x, p["ln1_w"], p["ln1_b"])
    q = (xn @ p["wq"]).reshape(B, T, heads, dh).transpose(0, 2, 1, 3)
    k = (xn @ p["wk"]).reshape(B, T, heads, dh).transpose(0, 2, 1, 3)
    v = (xn @ p["wv"]).reshape(B, T, heads, dh).transpose(0, 2, 1, 3)
    s = jnp.einsum("bhtd,bhsd->bhts", q, k) * (dh ** -0.5)
    a = jax.nn.softmax(s, axis=-1)
    o = jnp.einsum("bhts,bhsd->bhtd", a, v).transpose(0, 2, 1, 3).reshape(B, T, D)
    y = o @ p["wo"] + x
    yn = _ln_ref(y, p["ln2_w"], p["ln2_b"])
    h = jax.nn.gelu(yn @ p["w1"] + p["b1"], approximate=False)
    return h @ p["w2"] + p["b2"] + y


def transformer_encoder_ref_f32(x, layer_params, *, heads, extract_layers):
    extracted = []
    for depth, p in enumerate(layer_params):
        x = _block_ref_f32(x, p, heads)
        if depth + 1 in extract_layers:
            extracted.append(x)
    return extracted


def _block_ref_bf16(x, pp, heads):
    """Mirrors the kernel's bf16-operand / f32-accumulate math (exact softmax/erf)."""
    cdt = pp["wqkv"].dtype
    B, T, D = x.shape
    dh = D // heads
    xn = _ln_ref(x, pp["ln1_w"], pp["ln1_b"])
    qkv = jnp.einsum("btd,de->bte", xn.astype(cdt), pp["wqkv"],
                     preferred_element_type=jnp.float32)
    q = qkv[..., 0 * D:1 * D].reshape(B, T, heads, dh).transpose(0, 2, 1, 3).astype(cdt)
    k = qkv[..., 1 * D:2 * D].reshape(B, T, heads, dh).transpose(0, 2, 1, 3).astype(cdt)
    v = qkv[..., 2 * D:3 * D].reshape(B, T, heads, dh).transpose(0, 2, 1, 3).astype(cdt)
    s = jnp.einsum("bhqd,bhkd->bhqk", q, k, preferred_element_type=jnp.float32)
    a = jax.nn.softmax(s, axis=-1)
    o = jnp.einsum("bhqk,bhkd->bhqd", a.astype(cdt), v,
                   preferred_element_type=jnp.float32)
    o = o.transpose(0, 2, 1, 3).reshape(B, T, D)
    y = jnp.einsum("btd,de->bte", o.astype(cdt), pp["wo"],
                   preferred_element_type=jnp.float32) + x
    yn = _ln_ref(y, pp["ln2_w"], pp["ln2_b"])
    h1 = jnp.einsum("btd,df->btf", yn.astype(cdt), pp["w1"],
                    preferred_element_type=jnp.float32) + pp["b1"]
    h1 = jax.nn.gelu(h1, approximate=False)
    h2 = jnp.einsum("btf,fd->btd", h1.astype(cdt), pp["w2"],
                    preferred_element_type=jnp.float32) + pp["b2"]
    return h2 + y


def transformer_encoder_ref_bf16(x, layer_params, *, heads, extract_layers,
                                 compute_dtype=jnp.bfloat16):
    extracted = []
    for depth, p in enumerate(layer_params):
        pp = prep_block_params(p, heads=heads, compute_dtype=compute_dtype)
        x = _block_ref_bf16(x, pp, heads)
        if depth + 1 in extract_layers:
            extracted.append(x)
    return extracted


# ----------------------------------- params -------------------------------------

def init_block_params(key, D, F):
    ks = jax.random.split(key, 8)
    s = 0.05
    return dict(
        ln1_w=jnp.ones((D,), jnp.float32),
        ln1_b=jnp.zeros((D,), jnp.float32),
        wq=s * jax.random.normal(ks[0], (D, D), jnp.float32),
        wk=s * jax.random.normal(ks[1], (D, D), jnp.float32),
        wv=s * jax.random.normal(ks[2], (D, D), jnp.float32),
        wo=s * jax.random.normal(ks[3], (D, D), jnp.float32),
        ln2_w=jnp.ones((D,), jnp.float32),
        ln2_b=jnp.zeros((D,), jnp.float32),
        w1=s * jax.random.normal(ks[4], (D, F), jnp.float32),
        b1=s * jax.random.normal(ks[5], (F,), jnp.float32),
        w2=s * jax.random.normal(ks[6], (F, D), jnp.float32),
        b2=s * jax.random.normal(ks[7], (D,), jnp.float32),
    )


# ------------------------------------ main ---------------------------------------

if __name__ == "__main__":
    B, T, D, H, F = 2, 8, 32, 4, 64          # batch, tokens, embed_dim, heads, dim_linear_block
    NUM_LAYERS = 2
    EXTRACT_LAYERS = (1, 2)

    key = jax.random.PRNGKey(0)
    keys = jax.random.split(key, NUM_LAYERS + 1)
    x = jax.random.normal(keys[0], (B, T, D), jnp.float32)
    layer_params = [init_block_params(keys[i + 1], D, F) for i in range(NUM_LAYERS)]

    outs = transformer_encoder(x, layer_params, heads=H, extract_layers=EXTRACT_LAYERS)
    outs = jax.block_until_ready(outs)

    # Reference 1: same bf16-operand math as the kernel (tight check of kernel structure).
    refs_b = transformer_encoder_ref_bf16(x, layer_params, heads=H,
                                          extract_layers=EXTRACT_LAYERS)
    refs_b = jax.block_until_ready(refs_b)
    # Reference 2: pure fp32 (mirrors the PyTorch module); loose tol due to bf16 MXU inputs.
    refs_f = transformer_encoder_ref_f32(x, layer_params, heads=H,
                                         extract_layers=EXTRACT_LAYERS)
    refs_f = jax.block_until_ready(refs_f)

    assert len(outs) == len(refs_b) == len(refs_f) == len(EXTRACT_LAYERS)
    for o, rb, rf in zip(outs, refs_b, refs_f):
        assert o.shape == (B, T, D) and o.dtype == jnp.float32
        if not jnp.allclose(o, rb, atol=1e-2, rtol=1e-2):
            raise AssertionError("Pallas output mismatch vs bf16-matmul JAX reference")
        if not jnp.allclose(o, rf, atol=5e-2, rtol=5e-2):
            raise AssertionError("Pallas output mismatch vs fp32 JAX reference")

    print("KERNEL_OK")
</pallas_src>

<mosaic_0001>
module attributes {stable_mosaic.version = 11 : i64} {
  func.func @transformer_block_kernel(%arg0: i32, %arg1: memref<1x8x32xf32, #tpu.memory_space<vmem>>, %arg2: memref<1x32xf32, #tpu.memory_space<vmem>>, %arg3: memref<1x32xf32, #tpu.memory_space<vmem>>, %arg4: memref<32x96xbf16, #tpu.memory_space<vmem>>, %arg5: memref<32x32xbf16, #tpu.memory_space<vmem>>, %arg6: memref<1x32xf32, #tpu.memory_space<vmem>>, %arg7: memref<1x32xf32, #tpu.memory_space<vmem>>, %arg8: memref<32x64xbf16, #tpu.memory_space<vmem>>, %arg9: memref<1x64xf32, #tpu.memory_space<vmem>>, %arg10: memref<64x32xbf16, #tpu.memory_space<vmem>>, %arg11: memref<1x32xf32, #tpu.memory_space<vmem>>, %arg12: memref<1x8x32xf32, #tpu.memory_space<vmem>>) attributes {dimension_semantics = [#tpu.dimension_semantics<parallel>], iteration_bounds = array<i64: 2>, scalar_prefetch = 0 : i64, scratch_operands = 0 : i64, tpu.core_type = #tpu.core_type<tc>, window_params = [{transform_indices = @transform_0, window_bounds = array<i64: 1, 8, 32>}, {pipeline_mode = #tpu.pipeline_mode<synchronous>, transform_indices = @transform_1, window_bounds = array<i64: 1, 32>}, {pipeline_mode = #tpu.pipeline_mode<synchronous>, transform_indices = @transform_2, window_bounds = array<i64: 1, 32>}, {pipeline_mode = #tpu.pipeline_mode<synchronous>, transform_indices = @transform_3, window_bounds = array<i64: 32, 96>}, {pipeline_mode = #tpu.pipeline_mode<synchronous>, transform_indices = @transform_4, window_bounds = array<i64: 32, 32>}, {pipeline_mode = #tpu.pipeline_mode<synchronous>, transform_indices = @transform_5, window_bounds = array<i64: 1, 32>}, {pipeline_mode = #tpu.pipeline_mode<synchronous>, transform_indices = @transform_6, window_bounds = array<i64: 1, 32>}, {pipeline_mode = #tpu.pipeline_mode<synchronous>, transform_indices = @transform_7, window_bounds = array<i64: 32, 64>}, {pipeline_mode = #tpu.pipeline_mode<synchronous>, transform_indices = @transform_8, window_bounds = array<i64: 1, 64>}, {pipeline_mode = #tpu.pipeline_mode<synchronous>, transform_indices = @transform_9, window_bounds = array<i64: 64, 32>}, {pipeline_mode = #tpu.pipeline_mode<synchronous>, transform_indices = @transform_10, window_bounds = array<i64: 1, 32>}, {transform_indices = @transform_11, window_bounds = array<i64: 1, 8, 32>}]} {
    %c0 = arith.constant 0 : index
    %c0_0 = arith.constant 0 : index
    %c0_1 = arith.constant 0 : index
    %0 = vector.load %arg1[%c0, %c0_0, %c0_1] : memref<1x8x32xf32, #tpu.memory_space<vmem>>, vector<1x8x32xf32>
    %1 = vector.shape_cast %0 : vector<1x8x32xf32> to vector<8x32xf32>
    %c0_2 = arith.constant 0 : index
    %c0_3 = arith.constant 0 : index
    %2 = vector.load %arg2[%c0_2, %c0_3] : memref<1x32xf32, #tpu.memory_space<vmem>>, vector<1x32xf32>
    %c0_4 = arith.constant 0 : index
    %c0_5 = arith.constant 0 : index
    %3 = vector.load %arg3[%c0_4, %c0_5] : memref<1x32xf32, #tpu.memory_space<vmem>>, vector<1x32xf32>
    %cst = arith.constant dense<0.000000e+00> : vector<8xf32>
    %4 = vector.multi_reduction <add>, %1, %cst [1] : vector<8x32xf32> to vector<8xf32>
    %5 = vector.shape_cast %4 : vector<8xf32> to vector<8x1xf32>
    %cst_6 = arith.constant 3.200000e+01 : f32
    %6 = vector.broadcast %cst_6 : f32 to vector<8x1xf32>
    %7 = arith.divf %5, %6 : vector<8x1xf32>
    %8 = vector.broadcast %7 : vector<8x1xf32> to vector<8x32xf32>
    %9 = arith.subf %1, %8 : vector<8x32xf32>
    %10 = arith.mulf %9, %9 : vector<8x32xf32>
    %cst_7 = arith.constant dense<0.000000e+00> : vector<8xf32>
    %11 = vector.multi_reduction <add>, %10, %cst_7 [1] : vector<8x32xf32> to vector<8xf32>
    %12 = vector.shape_cast %11 : vector<8xf32> to vector<8x1xf32>
    %cst_8 = arith.constant 3.200000e+01 : f32
    %13 = vector.broadcast %cst_8 : f32 to vector<8x1xf32>
    %14 = arith.divf %12, %13 : vector<8x1xf32>
    %15 = vector.broadcast %7 : vector<8x1xf32> to vector<8x32xf32>
    %16 = arith.subf %1, %15 : vector<8x32xf32>
    %cst_9 = arith.constant 9.99999974E-6 : f32
    %17 = vector.broadcast %cst_9 : f32 to vector<8x1xf32>
    %18 = arith.addf %14, %17 : vector<8x1xf32>
    %19 = math.rsqrt %18 : vector<8x1xf32>
    %20 = vector.broadcast %19 : vector<8x1xf32> to vector<8x32xf32>
    %21 = arith.mulf %16, %20 : vector<8x32xf32>
    %22 = vector.broadcast %2 : vector<1x32xf32> to vector<8x32xf32>
    %23 = arith.mulf %21, %22 : vector<8x32xf32>
    %24 = vector.broadcast %3 : vector<1x32xf32> to vector<8x32xf32>
    %25 = arith.addf %23, %24 : vector<8x32xf32>
    %26 = arith.truncf %25 : vector<8x32xf32> to vector<8x32xbf16>
    %c0_10 = arith.constant 0 : index
    %c0_11 = arith.constant 0 : index
    %27 = vector.load %arg4[%c0_10, %c0_11] : memref<32x96xbf16, #tpu.memory_space<vmem>>, vector<32x96xbf16>
    %cst_12 = arith.constant dense<0.000000e+00> : vector<8x96xf32>
    %28 = tpu.matmul %26, %27, %cst_12 {dimension_numbers = #tpu.dot_dimension_numbers<[1], [0], [0], [1], [0, 0, 1, 1], [], []>} : vector<8x32xbf16>, vector<32x96xbf16>, vector<8x96xf32> -> vector<8x96xf32>
    %29 = vector.extract_strided_slice %28 {offsets = [0, 0], sizes = [8, 32], strides = [1, 1]} : vector<8x96xf32> to vector<8x32xf32>
    %30 = vector.shape_cast %29 : vector<8x32xf32> to vector<8x4x8xf32>
    %31 = tpu.transpose %30, [1, 0, 2] : vector<8x4x8xf32> -> vector<4x8x8xf32>
    %32 = arith.truncf %31 : vector<4x8x8xf32> to vector<4x8x8xbf16>
    %33 = vector.extract_strided_slice %28 {offsets = [0, 32], sizes = [8, 32], strides = [1, 1]} : vector<8x96xf32> to vector<8x32xf32>
    %34 = vector.shape_cast %33 : vector<8x32xf32> to vector<8x4x8xf32>
    %35 = tpu.transpose %34, [1, 0, 2] : vector<8x4x8xf32> -> vector<4x8x8xf32>
    %36 = arith.truncf %35 : vector<4x8x8xf32> to vector<4x8x8xbf16>
    %37 = vector.extract_strided_slice %28 {offsets = [0, 64], sizes = [8, 32], strides = [1, 1]} : vector<8x96xf32> to vector<8x32xf32>
    %38 = vector.shape_cast %37 : vector<8x32xf32> to vector<8x4x8xf32>
    %39 = tpu.transpose %38, [1, 0, 2] : vector<8x4x8xf32> -> vector<4x8x8xf32>
    %40 = arith.truncf %39 : vector<4x8x8xf32> to vector<4x8x8xbf16>
    "tpu.trace_start"() <{level = 10 : i32, message = "hqd,hkd->hqk"}> : () -> ()
    %cst_13 = arith.constant dense<0.000000e+00> : vector<4x8x8xf32>
    %41 = tpu.matmul %32, %36, %cst_13 {dimension_numbers = #tpu.dot_dimension_numbers<[2], [2], [1], [1], [0, 0, 0, 1, 1, 1], [0], [0]>} : vector<4x8x8xbf16>, vector<4x8x8xbf16>, vector<4x8x8xf32> -> vector<4x8x8xf32>
    "tpu.trace_stop"() : () -> ()
    %cst_14 = arith.constant dense<0xFF800000> : vector<4x8xf32>
    %42 = vector.multi_reduction <maximumf>, %41, %cst_14 [2] : vector<4x8x8xf32> to vector<4x8xf32>
    %43 = vector.shape_cast %42 : vector<4x8xf32> to vector<4x8x1xf32>
    %44 = vector.broadcast %43 : vector<4x8x1xf32> to vector<4x8x8xf32>
    %45 = arith.subf %41, %44 : vector<4x8x8xf32>
    %46 = math.exp %45 : vector<4x8x8xf32>
    %cst_15 = arith.constant dense<0.000000e+00> : vector<4x8xf32>
    %47 = vector.multi_reduction <add>, %46, %cst_15 [2] : vector<4x8x8xf32> to vector<4x8xf32>
    %48 = vector.shape_cast %47 : vector<4x8xf32> to vector<4x8x1xf32>
    %49 = tpu.reciprocal %48 {approx = true} : vector<4x8x1xf32> -> vector<4x8x1xf32>
    %50 = vector.broadcast %49 : vector<4x8x1xf32> to vector<4x8x8xf32>
    %51 = arith.mulf %46, %50 : vector<4x8x8xf32>
    %52 = arith.truncf %51 : vector<4x8x8xf32> to vector<4x8x8xbf16>
    "tpu.trace_start"() <{level = 10 : i32, message = "hqk,hkd->hqd"}> : () -> ()
    %cst_16 = arith.constant dense<0.000000e+00> : vector<4x8x8xf32>
    %53 = tpu.matmul %52, %40, %cst_16 {dimension_numbers = #tpu.dot_dimension_numbers<[2], [1], [1], [2], [0, 0, 0, 1, 1, 2], [0], [0]>} : vector<4x8x8xbf16>, vector<4x8x8xbf16>, vector<4x8x8xf32> -> vector<4x8x8xf32>
    "tpu.trace_stop"() : () -> ()
    %54 = tpu.transpose %53, [1, 0, 2] : vector<4x8x8xf32> -> vector<8x4x8xf32>
    %55 = vector.shape_cast %54 : vector<8x4x8xf32> to vector<8x32xf32>
    %56 = arith.truncf %55 : vector<8x32xf32> to vector<8x32xbf16>
    %c0_17 = arith.constant 0 : index
    %c0_18 = arith.constant 0 : index
    %57 = vector.load %arg5[%c0_17, %c0_18] : memref<32x32xbf16, #tpu.memory_space<vmem>>, vector<32x32xbf16>
    %cst_19 = arith.constant dense<0.000000e+00> : vector<8x32xf32>
    %58 = tpu.matmul %56, %57, %cst_19 {dimension_numbers = #tpu.dot_dimension_numbers<[1], [0], [0], [1], [0, 0, 1, 1], [], []>} : vector<8x32xbf16>, vector<32x32xbf16>, vector<8x32xf32> -> vector<8x32xf32>
    %59 = arith.addf %58, %1 : vector<8x32xf32>
    %c0_20 = arith.constant 0 : index
    %c0_21 = arith.constant 0 : index
    %60 = vector.load %arg6[%c0_20, %c0_21] : memref<1x32xf32, #tpu.memory_space<vmem>>, vector<1x32xf32>
    %c0_22 = arith.constant 0 : index
    %c0_23 = arith.constant 0 : index
    %61 = vector.load %arg7[%c0_22, %c0_23] : memref<1x32xf32, #tpu.memory_space<vmem>>, vector<1x32xf32>
    %cst_24 = arith.constant dense<0.000000e+00> : vector<8xf32>
    %62 = vector.multi_reduction <add>, %59, %cst_24 [1] : vector<8x32xf32> to vector<8xf32>
    %63 = vector.shape_cast %62 : vector<8xf32> to vector<8x1xf32>
    %cst_25 = arith.constant 3.200000e+01 : f32
    %64 = vector.broadcast %cst_25 : f32 to vector<8x1xf32>
    %65 = arith.divf %63, %64 : vector<8x1xf32>
    %66 = vector.broadcast %65 : vector<8x1xf32> to vector<8x32xf32>
    %67 = arith.subf %59, %66 : vector<8x32xf32>
    %68 = arith.mulf %67, %67 : vector<8x32xf32>
    %cst_26 = arith.constant dense<0.000000e+00> : vector<8xf32>
    %69 = vector.multi_reduction <add>, %68, %cst_26 [1] : vector<8x32xf32> to vector<8xf32>
    %70 = vector.shape_cast %69 : vector<8xf32> to vector<8x1xf32>
    %cst_27 = arith.constant 3.200000e+01 : f32
    %71 = vector.broadcast %cst_27 : f32 to vector<8x1xf32>
    %72 = arith.divf %70, %71 : vector<8x1xf32>
    %73 = vector.broadcast %65 : vector<8x1xf32> to vector<8x32xf32>
    %74 = arith.subf %59, %73 : vector<8x32xf32>
    %cst_28 = arith.constant 9.99999974E-6 : f32
    %75 = vector.broadcast %cst_28 : f32 to vector<8x1xf32>
    %76 = arith.addf %72, %75 : vector<8x1xf32>
    %77 = math.rsqrt %76 : vector<8x1xf32>
    %78 = vector.broadcast %77 : vector<8x1xf32> to vector<8x32xf32>
    %79 = arith.mulf %74, %78 : vector<8x32xf32>
    %80 = vector.broadcast %60 : vector<1x32xf32> to vector<8x32xf32>
    %81 = arith.mulf %79, %80 : vector<8x32xf32>
    %82 = vector.broadcast %61 : vector<1x32xf32> to vector<8x32xf32>
    %83 = arith.addf %81, %82 : vector<8x32xf32>
    %84 = arith.truncf %83 : vector<8x32xf32> to vector<8x32xbf16>
    %c0_29 = arith.constant 0 : index
    %c0_30 = arith.constant 0 : index
    %85 = vector.load %arg8[%c0_29, %c0_30] : memref<32x64xbf16, #tpu.memory_space<vmem>>, vector<32x64xbf16>
    %cst_31 = arith.constant dense<0.000000e+00> : vector<8x64xf32>
    %86 = tpu.matmul %84, %85, %cst_31 {dimension_numbers = #tpu.dot_dimension_numbers<[1], [0], [0], [1], [0, 0, 1, 1], [], []>} : vector<8x32xbf16>, vector<32x64xbf16>, vector<8x64xf32> -> vector<8x64xf32>
    %c0_32 = arith.constant 0 : index
    %c0_33 = arith.constant 0 : index
    %87 = vector.load %arg9[%c0_32, %c0_33] : memref<1x64xf32, #tpu.memory_space<vmem>>, vector<1x64xf32>
    %88 = vector.broadcast %87 : vector<1x64xf32> to vector<8x64xf32>
    %89 = arith.addf %86, %88 : vector<8x64xf32>
    %cst_34 = arith.constant 5.000000e-01 : f32
    %90 = vector.broadcast %cst_34 : f32 to vector<8x64xf32>
    %91 = arith.mulf %90, %89 : vector<8x64xf32>
    %cst_35 = arith.constant 0.707106769 : f32
    %92 = vector.broadcast %cst_35 : f32 to vector<8x64xf32>
    %93 = arith.mulf %89, %92 : vector<8x64xf32>
    %94 = math.absf %93 : vector<8x64xf32>
    %cst_36 = arith.constant 0.327591091 : f32
    %95 = vector.broadcast %cst_36 : f32 to vector<8x64xf32>
    %96 = arith.mulf %95, %94 : vector<8x64xf32>
    %cst_37 = arith.constant 1.000000e+00 : f32
    %97 = vector.broadcast %cst_37 : f32 to vector<8x64xf32>
    %98 = arith.addf %97, %96 : vector<8x64xf32>
    %cst_38 = arith.constant 1.000000e+00 : f32
    %99 = vector.broadcast %cst_38 : f32 to vector<8x64xf32>
    %100 = arith.divf %99, %98 : vector<8x64xf32>
    %cst_39 = arith.constant 1.06140542 : f32
    %101 = vector.broadcast %cst_39 : f32 to vector<8x64xf32>
    %102 = arith.mulf %101, %100 : vector<8x64xf32>
    %cst_40 = arith.constant -1.45315206 : f32
    %103 = vector.broadcast %cst_40 : f32 to vector<8x64xf32>
    %104 = arith.addf %102, %103 : vector<8x64xf32>
    %105 = arith.mulf %104, %100 : vector<8x64xf32>
    %cst_41 = arith.constant 1.42141378 : f32
    %106 = vector.broadcast %cst_41 : f32 to vector<8x64xf32>
    %107 = arith.addf %105, %106 : vector<8x64xf32>
    %108 = arith.mulf %107, %100 : vector<8x64xf32>
    %cst_42 = arith.constant -0.284496725 : f32
    %109 = vector.broadcast %cst_42 : f32 to vector<8x64xf32>
    %110 = arith.addf %108, %109 : vector<8x64xf32>
    %111 = arith.mulf %110, %100 : vector<8x64xf32>
    %cst_43 = arith.constant 0.254829586 : f32
    %112 = vector.broadcast %cst_43 : f32 to vector<8x64xf32>
    %113 = arith.addf %111, %112 : vector<8x64xf32>
    %114 = arith.mulf %113, %100 : vector<8x64xf32>
    %cst_44 = arith.constant 0.000000e+00 : f32
    %115 = vector.broadcast %cst_44 : f32 to vector<8x64xf32>
    %116 = arith.subf %115, %94 : vector<8x64xf32>
    %117 = arith.mulf %116, %94 : vector<8x64xf32>
    %118 = math.exp %117 : vector<8x64xf32>
    %119 = arith.mulf %114, %118 : vector<8x64xf32>
    %cst_45 = arith.constant 1.000000e+00 : f32
    %120 = vector.broadcast %cst_45 : f32 to vector<8x64xf32>
    %121 = arith.subf %120, %119 : vector<8x64xf32>
    %cst_46 = arith.constant 0.000000e+00 : f32
    %122 = vector.broadcast %cst_46 : f32 to vector<8x64xf32>
    %123 = arith.cmpf oge, %93, %122 : vector<8x64xf32>
    %cst_47 = arith.constant 0.000000e+00 : f32
    %124 = vector.broadcast %cst_47 : f32 to vector<8x64xf32>
    %125 = arith.subf %124, %121 : vector<8x64xf32>
    %126 = arith.select %123, %121, %125 : vector<8x64xi1>, vector<8x64xf32>
    %cst_48 = arith.constant 1.000000e+00 : f32
    %127 = vector.broadcast %cst_48 : f32 to vector<8x64xf32>
    %128 = arith.addf %127, %126 : vector<8x64xf32>
    %129 = arith.mulf %91, %128 : vector<8x64xf32>
    %130 = arith.truncf %129 : vector<8x64xf32> to vector<8x64xbf16>
    %c0_49 = arith.constant 0 : index
    %c0_50 = arith.constant 0 : index
    %131 = vector.load %arg10[%c0_49, %c0_50] : memref<64x32xbf16, #tpu.memory_space<vmem>>, vector<64x32xbf16>
    %cst_51 = arith.constant dense<0.000000e+00> : vector<8x32xf32>
    %132 = tpu.matmul %130, %131, %cst_51 {dimension_numbers = #tpu.dot_dimension_numbers<[1], [0], [0], [1], [0, 0, 1, 1], [], []>} : vector<8x64xbf16>, vector<64x32xbf16>, vector<8x32xf32> -> vector<8x32xf32>
    %c0_52 = arith.constant 0 : index
    %c0_53 = arith.constant 0 : index
    %133 = vector.load %arg11[%c0_52, %c0_53] : memref<1x32xf32, #tpu.memory_space<vmem>>, vector<1x32xf32>
    %134 = vector.broadcast %133 : vector<1x32xf32> to vector<8x32xf32>
    %135 = arith.addf %132, %134 : vector<8x32xf32>
    %136 = arith.addf %135, %59 : vector<8x32xf32>
    %c0_54 = arith.constant 0 : index
    %c0_55 = arith.constant 0 : index
    %c0_56 = arith.constant 0 : index
    %137 = vector.load %arg12[%c0_54, %c0_55, %c0_56] : memref<1x8x32xf32, #tpu.memory_space<vmem>>, vector<1x8x32xf32>
    %138 = vector.shape_cast %137 : vector<1x8x32xf32> to vector<8x32xf32>
    %139 = vector.shape_cast %136 : vector<8x32xf32> to vector<1x8x32xf32>
    tpu.vector_store %arg12[%c0_54, %c0_55, %c0_56], %139 {strides = array<i32>} : memref<1x8x32xf32, #tpu.memory_space<vmem>>, vector<1x8x32xf32>,
    return
  }
  func.func @transform_0(%arg0: i32) -> (i32, i32, i32) {
    %c0_i32 = arith.constant 0 : i32
    %c0_i32_0 = arith.constant 0 : i32
    %c0_i32_1 = arith.constant 0 : i32
    return %arg0, %c0_i32, %c0_i32_0 : i32, i32, i32
  }
  func.func @transform_1(%arg0: i32) -> (i32, i32) {
    %c0_i32 = arith.constant 0 : i32
    %c0_i32_0 = arith.constant 0 : i32
    %c0_i32_1 = arith.constant 0 : i32
    return %c0_i32, %c0_i32_0 : i32, i32
  }
  func.func @transform_2(%arg0: i32) -> (i32, i32) {
    %c0_i32 = arith.constant 0 : i32
    %c0_i32_0 = arith.constant 0 : i32
    %c0_i32_1 = arith.constant 0 : i32
    return %c0_i32, %c0_i32_0 : i32, i32
  }
  func.func @transform_3(%arg0: i32) -> (i32, i32) {
    %c0_i32 = arith.constant 0 : i32
    %c0_i32_0 = arith.constant 0 : i32
    %c0_i32_1 = arith.constant 0 : i32
    return %c0_i32, %c0_i32_0 : i32, i32
  }
  func.func @transform_4(%arg0: i32) -> (i32, i32) {
    %c0_i32 = arith.constant 0 : i32
    %c0_i32_0 = arith.constant 0 : i32
    %c0_i32_1 = arith.constant 0 : i32
    return %c0_i32, %c0_i32_0 : i32, i32
  }
  func.func @transform_5(%arg0: i32) -> (i32, i32) {
    %c0_i32 = arith.constant 0 : i32
    %c0_i32_0 = arith.constant 0 : i32
    %c0_i32_1 = arith.constant 0 : i32
    return %c0_i32, %c0_i32_0 : i32, i32
  }
  func.func @transform_6(%arg0: i32) -> (i32, i32) {
    %c0_i32 = arith.constant 0 : i32
    %c0_i32_0 = arith.constant 0 : i32
    %c0_i32_1 = arith.constant 0 : i32
    return %c0_i32, %c0_i32_0 : i32, i32
  }
  func.func @transform_7(%arg0: i32) -> (i32, i32) {
    %c0_i32 = arith.constant 0 : i32
    %c0_i32_0 = arith.constant 0 : i32
    %c0_i32_1 = arith.constant 0 : i32
    return %c0_i32, %c0_i32_0 : i32, i32
  }
  func.func @transform_8(%arg0: i32) -> (i32, i32) {
    %c0_i32 = arith.constant 0 : i32
    %c0_i32_0 = arith.constant 0 : i32
    %c0_i32_1 = arith.constant 0 : i32
    return %c0_i32, %c0_i32_0 : i32, i32
  }
  func.func @transform_9(%arg0: i32) -> (i32, i32) {
    %c0_i32 = arith.constant 0 : i32
    %c0_i32_0 = arith.constant 0 : i32
    %c0_i32_1 = arith.constant 0 : i32
    return %c0_i32, %c0_i32_0 : i32, i32
  }
  func.func @transform_10(%arg0: i32) -> (i32, i32) {
    %c0_i32 = arith.constant 0 : i32
    %c0_i32_0 = arith.constant 0 : i32
    %c0_i32_1 = arith.constant 0 : i32
    return %c0_i32, %c0_i32_0 : i32, i32
  }
  func.func @transform_11(%arg0: i32) -> (i32, i32, i32) {
    %c0_i32 = arith.constant 0 : i32
    %c0_i32_0 = arith.constant 0 : i32
    %c0_i32_1 = arith.constant 0 : i32
    return %arg0, %c0_i32, %c0_i32_0 : i32, i32, i32
  }
}

module attributes {stable_mosaic.version = 11 : i64} {
  func.func @transformer_block_kernel(%arg0: i32, %arg1: memref<1x8x32xf32, #tpu.memory_space<vmem>>, %arg2: memref<1x32xf32, #tpu.memory_space<vmem>>, %arg3: memref<1x32xf32, #tpu.memory_space<vmem>>, %arg4: memref<32x96xbf16, #tpu.memory_space<vmem>>, %arg5: memref<32x32xbf16, #tpu.memory_space<vmem>>, %arg6: memref<1x32xf32, #tpu.memory_space<vmem>>, %arg7: memref<1x32xf32, #tpu.memory_space<vmem>>, %arg8: memref<32x64xbf16, #tpu.memory_space<vmem>>, %arg9: memref<1x64xf32, #tpu.memory_space<vmem>>, %arg10: memref<64x32xbf16, #tpu.memory_space<vmem>>, %arg11: memref<1x32xf32, #tpu.memory_space<vmem>>, %arg12: memref<1x8x32xf32, #tpu.memory_space<vmem>>) attributes {dimension_semantics = [#tpu.dimension_semantics<parallel>], iteration_bounds = array<i64: 2>, scalar_prefetch = 0 : i64, scratch_operands = 0 : i64, tpu.core_type = #tpu.core_type<tc>, window_params = [{transform_indices = @transform_0, window_bounds = array<i64: 1, 8, 32>}, {pipeline_mode = #tpu.pipeline_mode<synchronous>, transform_indices = @transform_1, window_bounds = array<i64: 1, 32>}, {pipeline_mode = #tpu.pipeline_mode<synchronous>, transform_indices = @transform_2, window_bounds = array<i64: 1, 32>}, {pipeline_mode = #tpu.pipeline_mode<synchronous>, transform_indices = @transform_3, window_bounds = array<i64: 32, 96>}, {pipeline_mode = #tpu.pipeline_mode<synchronous>, transform_indices = @transform_4, window_bounds = array<i64: 32, 32>}, {pipeline_mode = #tpu.pipeline_mode<synchronous>, transform_indices = @transform_5, window_bounds = array<i64: 1, 32>}, {pipeline_mode = #tpu.pipeline_mode<synchronous>, transform_indices = @transform_6, window_bounds = array<i64: 1, 32>}, {pipeline_mode = #tpu.pipeline_mode<synchronous>, transform_indices = @transform_7, window_bounds = array<i64: 32, 64>}, {pipeline_mode = #tpu.pipeline_mode<synchronous>, transform_indices = @transform_8, window_bounds = array<i64: 1, 64>}, {pipeline_mode = #tpu.pipeline_mode<synchronous>, transform_indices = @transform_9, window_bounds = array<i64: 64, 32>}, {pipeline_mode = #tpu.pipeline_mode<synchronous>, transform_indices = @transform_10, window_bounds = array<i64: 1, 32>}, {transform_indices = @transform_11, window_bounds = array<i64: 1, 8, 32>}]} {
    %c0 = arith.constant 0 : index
    %c0_0 = arith.constant 0 : index
    %c0_1 = arith.constant 0 : index
    %0 = vector.load %arg1[%c0, %c0_0, %c0_1] : memref<1x8x32xf32, #tpu.memory_space<vmem>>, vector<1x8x32xf32>
    %1 = vector.shape_cast %0 : vector<1x8x32xf32> to vector<8x32xf32>
    %c0_2 = arith.constant 0 : index
    %c0_3 = arith.constant 0 : index
    %2 = vector.load %arg2[%c0_2, %c0_3] : memref<1x32xf32, #tpu.memory_space<vmem>>, vector<1x32xf32>
    %c0_4 = arith.constant 0 : index
    %c0_5 = arith.constant 0 : index
    %3 = vector.load %arg3[%c0_4, %c0_5] : memref<1x32xf32, #tpu.memory_space<vmem>>, vector<1x32xf32>
    %cst = arith.constant dense<0.000000e+00> : vector<8xf32>
    %4 = vector.multi_reduction <add>, %1, %cst [1] : vector<8x32xf32> to vector<8xf32>
    %5 = vector.shape_cast %4 : vector<8xf32> to vector<8x1xf32>
    %cst_6 = arith.constant 3.200000e+01 : f32
    %6 = vector.broadcast %cst_6 : f32 to vector<8x1xf32>
    %7 = arith.divf %5, %6 : vector<8x1xf32>
    %8 = vector.broadcast %7 : vector<8x1xf32> to vector<8x32xf32>
    %9 = arith.subf %1, %8 : vector<8x32xf32>
    %10 = arith.mulf %9, %9 : vector<8x32xf32>
    %cst_7 = arith.constant dense<0.000000e+00> : vector<8xf32>
    %11 = vector.multi_reduction <add>, %10, %cst_7 [1] : vector<8x32xf32> to vector<8xf32>
    %12 = vector.shape_cast %11 : vector<8xf32> to vector<8x1xf32>
    %cst_8 = arith.constant 3.200000e+01 : f32
    %13 = vector.broadcast %cst_8 : f32 to vector<8x1xf32>
    %14 = arith.divf %12, %13 : vector<8x1xf32>
    %15 = vector.broadcast %7 : vector<8x1xf32> to vector<8x32xf32>
    %16 = arith.subf %1, %15 : vector<8x32xf32>
    %cst_9 = arith.constant 9.99999974E-6 : f32
    %17 = vector.broadcast %cst_9 : f32 to vector<8x1xf32>
    %18 = arith.addf %14, %17 : vector<8x1xf32>
    %19 = math.rsqrt %18 : vector<8x1xf32>
    %20 = vector.broadcast %19 : vector<8x1xf32> to vector<8x32xf32>
    %21 = arith.mulf %16, %20 : vector<8x32xf32>
    %22 = vector.broadcast %2 : vector<1x32xf32> to vector<8x32xf32>
    %23 = arith.mulf %21, %22 : vector<8x32xf32>
    %24 = vector.broadcast %3 : vector<1x32xf32> to vector<8x32xf32>
    %25 = arith.addf %23, %24 : vector<8x32xf32>
    %26 = arith.truncf %25 : vector<8x32xf32> to vector<8x32xbf16>
    %c0_10 = arith.constant 0 : index
    %c0_11 = arith.constant 0 : index
    %27 = vector.load %arg4[%c0_10, %c0_11] : memref<32x96xbf16, #tpu.memory_space<vmem>>, vector<32x96xbf16>
    %cst_12 = arith.constant dense<0.000000e+00> : vector<8x96xf32>
    %28 = tpu.matmul %26, %27, %cst_12 {dimension_numbers = #tpu.dot_dimension_numbers<[1], [0], [0], [1], [0, 0, 1, 1], [], []>} : vector<8x32xbf16>, vector<32x96xbf16>, vector<8x96xf32> -> vector<8x96xf32>
    %29 = vector.extract_strided_slice %28 {offsets = [0, 0], sizes = [8, 32], strides = [1, 1]} : vector<8x96xf32> to vector<8x32xf32>
    %30 = vector.shape_cast %29 : vector<8x32xf32> to vector<8x4x8xf32>
    %31 = tpu.transpose %30, [1, 0, 2] : vector<8x4x8xf32> -> vector<4x8x8xf32>
    %32 = arith.truncf %31 : vector<4x8x8xf32> to vector<4x8x8xbf16>
    %33 = vector.extract_strided_slice %28 {offsets = [0, 32], sizes = [8, 32], strides = [1, 1]} : vector<8x96xf32> to vector<8x32xf32>
    %34 = vector.shape_cast %33 : vector<8x32xf32> to vector<8x4x8xf32>
    %35 = tpu.transpose %34, [1, 0, 2] : vector<8x4x8xf32> -> vector<4x8x8xf32>
    %36 = arith.truncf %35 : vector<4x8x8xf32> to vector<4x8x8xbf16>
    %37 = vector.extract_strided_slice %28 {offsets = [0, 64], sizes = [8, 32], strides = [1, 1]} : vector<8x96xf32> to vector<8x32xf32>
    %38 = vector.shape_cast %37 : vector<8x32xf32> to vector<8x4x8xf32>
    %39 = tpu.transpose %38, [1, 0, 2] : vector<8x4x8xf32> -> vector<4x8x8xf32>
    %40 = arith.truncf %39 : vector<4x8x8xf32> to vector<4x8x8xbf16>
    "tpu.trace_start"() <{level = 10 : i32, message = "hqd,hkd->hqk"}> : () -> ()
    %cst_13 = arith.constant dense<0.000000e+00> : vector<4x8x8xf32>
    %41 = tpu.matmul %32, %36, %cst_13 {dimension_numbers = #tpu.dot_dimension_numbers<[2], [2], [1], [1], [0, 0, 0, 1, 1, 1], [0], [0]>} : vector<4x8x8xbf16>, vector<4x8x8xbf16>, vector<4x8x8xf32> -> vector<4x8x8xf32>
    "tpu.trace_stop"() : () -> ()
    %cst_14 = arith.constant dense<0xFF800000> : vector<4x8xf32>
    %42 = vector.multi_reduction <maximumf>, %41, %cst_14 [2] : vector<4x8x8xf32> to vector<4x8xf32>
    %43 = vector.shape_cast %42 : vector<4x8xf32> to vector<4x8x1xf32>
    %44 = vector.broadcast %43 : vector<4x8x1xf32> to vector<4x8x8xf32>
    %45 = arith.subf %41, %44 : vector<4x8x8xf32>
    %46 = math.exp %45 : vector<4x8x8xf32>
    %cst_15 = arith.constant dense<0.000000e+00> : vector<4x8xf32>
    %47 = vector.multi_reduction <add>, %46, %cst_15 [2] : vector<4x8x8xf32> to vector<4x8xf32>
    %48 = vector.shape_cast %47 : vector<4x8xf32> to vector<4x8x1xf32>
    %49 = tpu.reciprocal %48 {approx = true} : vector<4x8x1xf32> -> vector<4x8x1xf32>
    %50 = vector.broadcast %49 : vector<4x8x1xf32> to vector<4x8x8xf32>
    %51 = arith.mulf %46, %50 : vector<4x8x8xf32>
    %52 = arith.truncf %51 : vector<4x8x8xf32> to vector<4x8x8xbf16>
    "tpu.trace_start"() <{level = 10 : i32, message = "hqk,hkd->hqd"}> : () -> ()
    %cst_16 = arith.constant dense<0.000000e+00> : vector<4x8x8xf32>
    %53 = tpu.matmul %52, %40, %cst_16 {dimension_numbers = #tpu.dot_dimension_numbers<[2], [1], [1], [2], [0, 0, 0, 1, 1, 2], [0], [0]>} : vector<4x8x8xbf16>, vector<4x8x8xbf16>, vector<4x8x8xf32> -> vector<4x8x8xf32>
    "tpu.trace_stop"() : () -> ()
    %54 = tpu.transpose %53, [1, 0, 2] : vector<4x8x8xf32> -> vector<8x4x8xf32>
    %55 = vector.shape_cast %54 : vector<8x4x8xf32> to vector<8x32xf32>
    %56 = arith.truncf %55 : vector<8x32xf32> to vector<8x32xbf16>
    %c0_17 = arith.constant 0 : index
    %c0_18 = arith.constant 0 : index
    %57 = vector.load %arg5[%c0_17, %c0_18] : memref<32x32xbf16, #tpu.memory_space<vmem>>, vector<32x32xbf16>
    %cst_19 = arith.constant dense<0.000000e+00> : vector<8x32xf32>
    %58 = tpu.matmul %56, %57, %cst_19 {dimension_numbers = #tpu.dot_dimension_numbers<[1], [0], [0], [1], [0, 0, 1, 1], [], []>} : vector<8x32xbf16>, vector<32x32xbf16>, vector<8x32xf32> -> vector<8x32xf32>
    %59 = arith.addf %58, %1 : vector<8x32xf32>
    %c0_20 = arith.constant 0 : index
    %c0_21 = arith.constant 0 : index
    %60 = vector.load %arg6[%c0_20, %c0_21] : memref<1x32xf32, #tpu.memory_space<vmem>>, vector<1x32xf32>
    %c0_22 = arith.constant 0 : index
    %c0_23 = arith.constant 0 : index
    %61 = vector.load %arg7[%c0_22, %c0_23] : memref<1x32xf32, #tpu.memory_space<vmem>>, vector<1x32xf32>
    %cst_24 = arith.constant dense<0.000000e+00> : vector<8xf32>
    %62 = vector.multi_reduction <add>, %59, %cst_24 [1] : vector<8x32xf32> to vector<8xf32>
    %63 = vector.shape_cast %62 : vector<8xf32> to vector<8x1xf32>
    %cst_25 = arith.constant 3.200000e+01 : f32
    %64 = vector.broadcast %cst_25 : f32 to vector<8x1xf32>
    %65 = arith.divf %63, %64 : vector<8x1xf32>
    %66 = vector.broadcast %65 : vector<8x1xf32> to vector<8x32xf32>
    %67 = arith.subf %59, %66 : vector<8x32xf32>
    %68 = arith.mulf %67, %67 : vector<8x32xf32>
    %cst_26 = arith.constant dense<0.000000e+00> : vector<8xf32>
    %69 = vector.multi_reduction <add>, %68, %cst_26 [1] : vector<8x32xf32> to vector<8xf32>
    %70 = vector.shape_cast %69 : vector<8xf32> to vector<8x1xf32>
    %cst_27 = arith.constant 3.200000e+01 : f32
    %71 = vector.broadcast %cst_27 : f32 to vector<8x1xf32>
    %72 = arith.divf %70, %71 : vector<8x1xf32>
    %73 = vector.broadcast %65 : vector<8x1xf32> to vector<8x32xf32>
    %74 = arith.subf %59, %73 : vector<8x32xf32>
    %cst_28 = arith.constant 9.99999974E-6 : f32
    %75 = vector.broadcast %cst_28 : f32 to vector<8x1xf32>
    %76 = arith.addf %72, %75 : vector<8x1xf32>
    %77 = math.rsqrt %76 : vector<8x1xf32>
    %78 = vector.broadcast %77 : vector<8x1xf32> to vector<8x32xf32>
    %79 = arith.mulf %74, %78 : vector<8x32xf32>
    %80 = vector.broadcast %60 : vector<1x32xf32> to vector<8x32xf32>
    %81 = arith.mulf %79, %80 : vector<8x32xf32>
    %82 = vector.broadcast %61 : vector<1x32xf32> to vector<8x32xf32>
    %83 = arith.addf %81, %82 : vector<8x32xf32>
    %84 = arith.truncf %83 : vector<8x32xf32> to vector<8x32xbf16>
    %c0_29 = arith.constant 0 : index
    %c0_30 = arith.constant 0 : index
    %85 = vector.load %arg8[%c0_29, %c0_30] : memref<32x64xbf16, #tpu.memory_space<vmem>>, vector<32x64xbf16>
    %cst_31 = arith.constant dense<0.000000e+00> : vector<8x64xf32>
    %86 = tpu.matmul %84, %85, %cst_31 {dimension_numbers = #tpu.dot_dimension_numbers<[1], [0], [0], [1], [0, 0, 1, 1], [], []>} : vector<8x32xbf16>, vector<32x64xbf16>, vector<8x64xf32> -> vector<8x64xf32>
    %c0_32 = arith.constant 0 : index
    %c0_33 = arith.constant 0 : index
    %87 = vector.load %arg9[%c0_32, %c0_33] : memref<1x64xf32, #tpu.memory_space<vmem>>, vector<1x64xf32>
    %88 = vector.broadcast %87 : vector<1x64xf32> to vector<8x64xf32>
    %89 = arith.addf %86, %88 : vector<8x64xf32>
    %cst_34 = arith.constant 5.000000e-01 : f32
    %90 = vector.broadcast %cst_34 : f32 to vector<8x64xf32>
    %91 = arith.mulf %90, %89 : vector<8x64xf32>
    %cst_35 = arith.constant 0.707106769 : f32
    %92 = vector.broadcast %cst_35 : f32 to vector<8x64xf32>
    %93 = arith.mulf %89, %92 : vector<8x64xf32>
    %94 = math.absf %93 : vector<8x64xf32>
    %cst_36 = arith.constant 0.327591091 : f32
    %95 = vector.broadcast %cst_36 : f32 to vector<8x64xf32>
    %96 = arith.mulf %95, %94 : vector<8x64xf32>
    %cst_37 = arith.constant 1.000000e+00 : f32
    %97 = vector.broadcast %cst_37 : f32 to vector<8x64xf32>
    %98 = arith.addf %97, %96 : vector<8x64xf32>
    %cst_38 = arith.constant 1.000000e+00 : f32
    %99 = vector.broadcast %cst_38 : f32 to vector<8x64xf32>
    %100 = arith.divf %99, %98 : vector<8x64xf32>
    %cst_39 = arith.constant 1.06140542 : f32
    %101 = vector.broadcast %cst_39 : f32 to vector<8x64xf32>
    %102 = arith.mulf %101, %100 : vector<8x64xf32>
    %cst_40 = arith.constant -1.45315206 : f32
    %103 = vector.broadcast %cst_40 : f32 to vector<8x64xf32>
    %104 = arith.addf %102, %103 : vector<8x64xf32>
    %105 = arith.mulf %104, %100 : vector<8x64xf32>
    %cst_41 = arith.constant 1.42141378 : f32
    %106 = vector.broadcast %cst_41 : f32 to vector<8x64xf32>
    %107 = arith.addf %105, %106 : vector<8x64xf32>
    %108 = arith.mulf %107, %100 : vector<8x64xf32>
    %cst_42 = arith.constant -0.284496725 : f32
    %109 = vector.broadcast %cst_42 : f32 to vector<8x64xf32>
    %110 = arith.addf %108, %109 : vector<8x64xf32>
    %111 = arith.mulf %110, %100 : vector<8x64xf32>
    %cst_43 = arith.constant 0.254829586 : f32
    %112 = vector.broadcast %cst_43 : f32 to vector<8x64xf32>
    %113 = arith.addf %111, %112 : vector<8x64xf32>
    %114 = arith.mulf %113, %100 : vector<8x64xf32>
    %cst_44 = arith.constant 0.000000e+00 : f32
    %115 = vector.broadcast %cst_44 : f32 to vector<8x64xf32>
    %116 = arith.subf %115, %94 : vector<8x64xf32>
    %117 = arith.mulf %116, %94 : vector<8x64xf32>
    %118 = math.exp %117 : vector<8x64xf32>
    %119 = arith.mulf %114, %118 : vector<8x64xf32>
    %cst_45 = arith.constant 1.000000e+00 : f32
    %120 = vector.broadcast %cst_45 : f32 to vector<8x64xf32>
    %121 = arith.subf %120, %119 : vector<8x64xf32>
    %cst_46 = arith.constant 0.000000e+00 : f32
    %122 = vector.broadcast %cst_46 : f32 to vector<8x64xf32>
    %123 = arith.cmpf oge, %93, %122 : vector<8x64xf32>
    %cst_47 = arith.constant 0.000000e+00 : f32
    %124 = vector.broadcast %cst_47 : f32 to vector<8x64xf32>
    %125 = arith.subf %124, %121 : vector<8x64xf32>
    %126 = arith.select %123, %121, %125 : vector<8x64xi1>, vector<8x64xf32>
    %cst_48 = arith.constant 1.000000e+00 : f32
    %127 = vector.broadcast %cst_48 : f32 to vector<8x64xf32>
    %128 = arith.addf %127, %126 : vector<8x64xf32>
    %129 = arith.mulf %91, %128 : vector<8x64xf32>
    %130 = arith.truncf %129 : vector<8x64xf32> to vector<8x64xbf16>
    %c0_49 = arith.constant 0 : index
    %c0_50 = arith.constant 0 : index
    %131 = vector.load %arg10[%c0_49, %c0_50] : memref<64x32xbf16, #tpu.memory_space<vmem>>, vector<64x32xbf16>
    %cst_51 = arith.constant dense<0.000000e+00> : vector<8x32xf32>
    %132 = tpu.matmul %130, %131, %cst_51 {dimension_numbers = #tpu.dot_dimension_numbers<[1], [0], [0], [1], [0, 0, 1, 1], [], []>} : vector<8x64xbf16>, vector<64x32xbf16>, vector<8x32xf32> -> vector<8x32xf32>
    %c0_52 = arith.constant 0 : index
    %c0_53 = arith.constant 0 : index
    %133 = vector.load %arg11[%c0_52, %c0_53] : memref<1x32xf32, #tpu.memory_space<vmem>>, vector<1x32xf32>
    %134 = vector.broadcast %133 : vector<1x32xf32> to vector<8x32xf32>
    %135 = arith.addf %132, %134 : vector<8x32xf32>
    %136 = arith.addf %135, %59 : vector<8x32xf32>
    %c0_54 = arith.constant 0 : index
    %c0_55 = arith.constant 0 : index
    %c0_56 = arith.constant 0 : index
    %137 = vector.load %arg12[%c0_54, %c0_55, %c0_56] : memref<1x8x32xf32, #tpu.memory_space<vmem>>, vector<1x8x32xf32>
    %138 = vector.shape_cast %137 : vector<1x8x32xf32> to vector<8x32xf32>
    %139 = vector.shape_cast %136 : vector<8x32xf32> to vector<1x8x32xf32>
    tpu.vector_store %arg12[%c0_54, %c0_55, %c0_56], %139 {strides = array<i32>} : memref<1x8x32xf32, #tpu.memory_space<vmem>>, vector<1x8x32xf32>,
    return
  }
  func.func @transform_0(%arg0: i32) -> (i32, i32, i32) {
    %c0_i32 = arith.constant 0 : i32
    %c0_i32_0 = arith.constant 0 : i32
    %c0_i32_1 = arith.constant 0 : i32
    return %arg0, %c0_i32, %c0_i32_0 : i32, i32, i32
  }
  func.func @transform_1(%arg0: i32) -> (i32, i32) {
    %c0_i32 = arith.constant 0 : i32
    %c0_i32_0 = arith.constant 0 : i32
    %c0_i32_1 = arith.constant 0 : i32
    return %c0_i32, %c0_i32_0 : i32, i32
  }
  func.func @transform_2(%arg0: i32) -> (i32, i32) {
    %c0_i32 = arith.constant 0 : i32
    %c0_i32_0 = arith.constant 0 : i32
    %c0_i32_1 = arith.constant 0 : i32
    return %c0_i32, %c0_i32_0 : i32, i32
  }
  func.func @transform_3(%arg0: i32) -> (i32, i32) {
    %c0_i32 = arith.constant 0 : i32
    %c0_i32_0 = arith.constant 0 : i32
    %c0_i32_1 = arith.constant 0 : i32
    return %c0_i32, %c0_i32_0 : i32, i32
  }
  func.func @transform_4(%arg0: i32) -> (i32, i32) {
    %c0_i32 = arith.constant 0 : i32
    %c0_i32_0 = arith.constant 0 : i32
    %c0_i32_1 = arith.constant 0 : i32
    return %c0_i32, %c0_i32_0 : i32, i32
  }
  func.func @transform_5(%arg0: i32) -> (i32, i32) {
    %c0_i32 = arith.constant 0 : i32
    %c0_i32_0 = arith.constant 0 : i32
    %c0_i32_1 = arith.constant 0 : i32
    return %c0_i32, %c0_i32_0 : i32, i32
  }
  func.func @transform_6(%arg0: i32) -> (i32, i32) {
    %c0_i32 = arith.constant 0 : i32
    %c0_i32_0 = arith.constant 0 : i32
    %c0_i32_1 = arith.constant 0 : i32
    return %c0_i32, %c0_i32_0 : i32, i32
  }
  func.func @transform_7(%arg0: i32) -> (i32, i32) {
    %c0_i32 = arith.constant 0 : i32
    %c0_i32_0 = arith.constant 0 : i32
    %c0_i32_1 = arith.constant 0 : i32
    return %c0_i32, %c0_i32_0 : i32, i32
  }
  func.func @transform_8(%arg0: i32) -> (i32, i32) {
    %c0_i32 = arith.constant 0 : i32
    %c0_i32_0 = arith.constant 0 : i32
    %c0_i32_1 = arith.constant 0 : i32
    return %c0_i32, %c0_i32_0 : i32, i32
  }
  func.func @transform_9(%arg0: i32) -> (i32, i32) {
    %c0_i32 = arith.constant 0 : i32
    %c0_i32_0 = arith.constant 0 : i32
    %c0_i32_1 = arith.constant 0 : i32
    return %c0_i32, %c0_i32_0 : i32, i32
  }
  func.func @transform_10(%arg0: i32) -> (i32, i32) {
    %c0_i32 = arith.constant 0 : i32
    %c0_i32_0 = arith.constant 0 : i32
    %c0_i32_1 = arith.constant 0 : i32
    return %c0_i32, %c0_i32_0 : i32, i32
  }
  func.func @transform_11(%arg0: i32) -> (i32, i32, i32) {
    %c0_i32 = arith.constant 0 : i32
    %c0_i32_0 = arith.constant 0 : i32
    %c0_i32_1 = arith.constant 0 : i32
    return %arg0, %c0_i32, %c0_i32_0 : i32, i32, i32
  }
}

</mosaic_0001>

<bundles_post_ra>
// kernel: transformer_encoder.2
= control target key start
LH: loop header
LB: loop body
LE: loop exit
PB: predicated region body
PF: predicated region fallthrough
CT: control target
= control target key end

     0   :  { %s2115_s17 = smov 0   ;;  %s2383_s0 = inlined_call_operand.vmem [shape: f32[2,8,32], index: 0, kind: input, shape index: {}]   ;;  %s2384_s1 = inlined_call_operand.vmem [shape: f32[1,32], index: 1, kind: input, shape index: {}]   ;;  %s2385_s2 = inlined_call_operand.vmem [shape: f32[1,32], index: 2, kind: input, shape index: {}]   ;;  %s2386_s3 = inlined_call_operand.vmem [shape: bf16[32,96], index: 3, kind: input, shape index: {}]   ;;  %s2387_s4 = inlined_call_operand.vmem [shape: bf16[32,32], index: 4, kind: input, shape index: {}]   ;;  %s2388_s5 = inlined_call_operand.vmem [shape: f32[1,32], index: 5, kind: input, shape index: {}]   ;;  %s2389_s6 = inlined_call_operand.vmem [shape: f32[1,32], index: 6, kind: input, shape index: {}]   ;;  %s2390_s7 = inlined_call_operand.vmem [shape: bf16[32,64], index: 7, kind: input, shape index: {}]   ;;  %s2391_s8 = inlined_call_operand.vmem [shape: f32[1,64], index: 8, kind: input, shape index: {}]   ;;  %s2392_s9 = inlined_call_operand.vmem [shape: bf16[64,32], index: 9, kind: input, shape index: {}]   ;;  %s2393_s10 = inlined_call_operand.vmem [shape: f32[1,32], index: 10, kind: input, shape index: {}]   ;;  %s2394_s11 = inlined_call_operand.vmem [shape: f32[2,8,32], index: 11, kind: output, shape index: {}]  }
   0x1 LB: > { %s1822_s18 = sadd.s32 4294967295, %s2041_s17   ;;  %p1826_p0 = scmp.ge.s32.totalorder %s2041_s17, 1  ;;  %s2041_s17 = sphi %s2115_s17, %s21_s17  }
   0x2   : > { %p336_p1 = scmp.lt.s32.totalorder %s2041_s17, 3 }
   0x4   : > { %p337_p2 = pnand %p1826_p0, %p336_p1 }
   0x5   : > { %p374_p3 = scmp.lt.s32.totalorder (!%p337_p2), %s1822_s18, 1  ;;  %vm386_vm0 = vcmask (!%p337_p2), 261120   ;;  %v2001_v7 = vld [vmem:[%s2386_s3] sm:$0xff] (!%p337_p2)   ;;  %v2043_v8 = vmov (!%p337_p2), 0.0   ;;  %vm2044_vm1 = vmmov (!%p337_p2), 0   ;;  %v2002_v9 = vld [vmem:[%s2386_s3 + $0x8] sm:$0xff] (!%p337_p2)   ;;  %v490_v29 = vlaneseq (!%p337_p2) }
   0x6   : > { %340 = sbr.rel (%p337_p2) target bundleno = 2757 (0xac5), region = 64  ;;  %1897 = vmatprep.subr.bf16.mxu0 (!%p337_p2), %v2043_v8  ;;  %1901 = vmatprep.mubr.msk.bf16.mxu0 (!%p337_p2), %vm2044_vm1, %v2043_v8  ;;  %v1829_v14 = vld [vmem:[%s2384_s1] ss:$0 sm:$0xff] (!%p337_p2)  ;;  %s2045_s12 = smov (!%p337_p2), 104   ;;  %v2049_v27 = vmov (!%p337_p2), 1983009808  }
   0x7   : > { %1898 = vmatpush3.bf16.msra.mxu0 (!%p337_p2), %v2001_v7  ;;  %1905 = vmatprep.subr.bf16.mxu1 (!%p337_p2), %v2043_v8  ;;  %v1830_v16 = vld [vmem:[%s2385_s2] ss:$0 sm:$0xff] (!%p337_p2)  ;;  %s2046_s13 = smov (!%p337_p2), 120   ;;  %s2047_s14 = smov (!%p337_p2), 112   ;;  %v488_v28 = vunpack.c.l.s4 (!%p337_p2), %v2049_v27  ;;  %v491_v31 = vshrl.u32 (!%p337_p2), %v490_v29, 7  ;;  %vm929_vm2 = vcmask (!%p337_p2), 64512  }
   0x8   : > { %1899 = vmatprep.subr.bf16.mxu0 (!%p337_p2), %v2043_v8  ;;  %1907 = vmatprep.mubr.msk.bf16.mxu1 (!%p337_p2), %vm2044_vm1, %v2043_v8  ;;  %s2048_s15 = smov (!%p337_p2), 96   ;;  %v2050_v33 = vmov (!%p337_p2), 1934713408   ;;  %s2051_s16 = smov (!%p337_p2), 64   ;;  %vm1165_vm3 = vcmask (!%p337_p2), 1043456   ;;  %vm1496_vm4 = vcmask (!%p337_p2), 130048  }
   0x9   : > { %v489_v30 = vunpack.c.0.s8 (!%p337_p2), %v488_v28  ;;  %v520_v34 = vunpack.c.l.s4 (!%p337_p2), %v2050_v33  ;;  %s2052_s24 = smov (!%p337_p2), 16   ;;  %s2053_s25 = smov (!%p337_p2), 8   ;;  %vm1498_vm5 = vcmask (!%p337_p2), 195584   ;;  %vm1723_vm7 = vcmask (!%p337_p2), 523264  }
   0xa   : > { %s2054_s26 = smov (!%p337_p2), 24  }
   0xb   : > { %1900 = vmatpush3.bf16.msra.mxu0 (!%p337_p2), %v2002_v9  ;;  %v2179_v37 = vsub.s32 (!%p337_p2), %v489_v30, %v491_v31  ;;  %v521_v41 = vunpack.c.0.s8 (!%p337_p2), %v520_v34 }
   0xc   : > { %1911 = vmatprep.subr.bf16.mxu0 (!%p337_p2), %v2043_v8 }
   0xd   : > { %s2396_s18 = smov (!%p374_p3, %s1822_s18), 1  ;;  %v2189_v47 = vsub.s32 %v521_v41, %v491_v31 }
   0xe   : > { %s1827_s19 = sshll.u32 %s2396_s18, 3 }
   0xf   : > { %s377_s22 = scalar_lea.vmem %s2383_s0, %s1827_s19 }
  0x10   : > { %v2131_v0 = vld [vmem:[%s377_s22] sm:$0xff] }
  0x11   : > { %v387_v1 = vsel %vm386_vm0, %v2131_v0, 0.0 }
  0x12   : > { %388 = vadd.xlane.f32.xlu0 %v387_v1 }
  0x9f   : > { %v389_v2 = vpop.xlane.xlu0 %388 }
  0xa0   : > { %v391_v3 = vmul.f32 0.03125, %v389_v2 }
  0xa2   : > { %v392_v4 = vsub.f32 %v2131_v0, %v391_v3 }
  0xa4   : > { %v393_v5 = vmul.f32 %v392_v4, %v392_v4 }
  0xa6   : > { %v394_v6 = vsel %vm386_vm0, %v393_v5, 0.0 }
  0xa7   : > { %395 = vadd.xlane.f32.xlu0 %v394_v6 }
 0x134   : > { %v396_v10 = vpop.xlane.xlu0 %395 }
 0x135   : > { %v397_v11 = vmul.f32 0.03125, %v396_v10 }
 0x137   : > { %v398_v12 = vadd.f32 1e-05, %v397_v11 }
 0x139   : > { %2011 = vrsqrt.f32 %v398_v12 }
 0x143   : > { %v2012_v13 = vpop.eup %2011 }
 0x144   : > { %v400_v15 = vmul.f32 %v2012_v13, %v392_v4 }
 0x146   : > { %v407_v17 = vmul.f32 %v1829_v14, %v400_v15 }
 0x148   : > { %v414_v18 = vadd.f32 %v1830_v16, %v407_v17 }
 0x14a   : > { %v415_v19 = vpack.c.bf16 %v414_v18, %v414_v18 }
 0x14c   : > { %1902 = vmatmul.mubr.msk.bf16.vlgmr.msra.gmra.mrb[0].mxu0 %vm386_vm0, %v415_v19 }
 0x14d   : > { %1913 = vmatprep.mubr.msk.bf16.mxu0 %vm2044_vm1, %v2043_v8 }
 0x21f   : > { %v2160_v20 = vpop.f32.mrb[0].mxu0 }
 0x220   : > { %482 = vrot.lane.b32.xlu0 %v2160_v20, %s2045_s12  ;;  %476 = vrot.lane.b32.xlu1 %v2160_v20, %s2046_s13  ;;  %v1903_v21 = vpop.f32.mrb[1].mxu0 }
 0x221   : > { %v472_v22 = vpop.f32.mrb[2].mxu0 }
 0x222   : > { %v1904_v23 = vpop.f32.mrb[3].mxu0 }
 0x224   : > { %479 = vrot.lane.b32.xlu1 %v2160_v20, %s2047_s14  ;;  %s381_s14 = scalar_lea.vmem %s2394_s11, %s1827_s19 }
 0x228   : > { %625 = vrot.lane.b32.xlu1 %v2160_v20, %s2048_s15 }
 0x292   : > { %v2166_v24 = vpop.permute.xlu1 %476  ;;  %v2172_v26 = vpop.permute.xlu0 %482 }
 0x293   : > { %627 = vrot.lane.b32.xlu1 %v2166_v24, %s2048_s15  ;;  %v501_v38 = vcombine.low %v2166_v24, %v2172_v26  ;;  %v502_v39 = vcombine.high %v2166_v24, %v2172_v26 }
 0x295   : > { %v509_v44 = vrot.slane %v501_v38, %v2179_v37  ;;  %v516_v45 = vrot.slane %v502_v39, %v2179_v37 }
 0x296   : > { %v2169_v25 = vpop.permute.xlu1 %479 }
 0x297   : > { %629 = vrot.lane.b32.xlu1 %v2169_v25, %s2048_s15  ;;  %v485_v35 = vcombine.low %v2160_v20, %v2169_v25  ;;  %v486_v36 = vcombine.high %v2160_v20, %v2169_v25 }
 0x299   : > { %v493_v42 = vrot.slane %v485_v35, %v2179_v37  ;;  %v500_v43 = vrot.slane %v486_v36, %v2179_v37 }
 0x29a   : > { %v626_v32 = vpop.permute.xlu1 %625 }
 0x29b   : > { %631 = vrot.lane.b32.xlu1 %v2172_v26, %s2048_s15  ;;  %v517_v48 = vcombine.low %v493_v42, %v509_v44  ;;  %v518_v49 = vcombine.high %v493_v42, %v509_v44  ;;  %v533_v50 = vcombine.low %v500_v43, %v516_v45  ;;  %v534_v51 = vcombine.high %v500_v43, %v516_v45 }
 0x29d   : > { %v525_v57 = vrot.slane %v517_v48, %v2189_v47  ;;  %v532_v58 = vrot.slane %v518_v49, %v2189_v47  ;;  %v541_v59 = vrot.slane %v533_v50, %v2189_v47  ;;  %v548_v60 = vrot.slane %v534_v51, %v2189_v47 }
 0x29f   : > { %v553_v6 = vcombine.low %v525_v57, %v532_v58  ;;  %v1834_v7 = vcombine.high %v525_v57, %v532_v58  ;;  %v569_v9 = vcombine.low %v541_v59, %v548_v60  ;;  %v1835_v10 = vcombine.high %v541_v59, %v548_v60 }
 0x2a1   : > { %v560_v19 = vrot.slane %v553_v6, %v2179_v37  ;;  %v568_v21 = vrot.slane %v1834_v7, %v2179_v37  ;;  %v576_v22 = vrot.slane %v569_v9, %v2179_v37  ;;  %v584_v23 = vrot.slane %v1835_v10, %v2179_v37 }
 0x2a3   : > { %v585_v38 = vcombine.low %v560_v19, %v568_v21  ;;  %v601_v39 = vcombine.low %v576_v22, %v584_v23 }
 0x2a5   : > { %v609_v48 = vrot.slane %v601_v39, %v2189_v47 }
 0x305   : > { %v628_v40 = vpop.permute.xlu1 %627 }
 0x309   : > { %v630_v46 = vpop.permute.xlu1 %629 }
 0x30a   : > { %v637_v52 = vcombine.low %v626_v32, %v630_v46  ;;  %v638_v53 = vcombine.high %v626_v32, %v630_v46  ;;  %v593_v46 = vrot.slane %v585_v38, %v2189_v47 }
 0x30c   : > { %v645_v61 = vrot.slane %v637_v52, %v2179_v37  ;;  %v652_v62 = vrot.slane %v638_v53, %v2179_v37  ;;  %v586_v53 = vcombine.high %v560_v19, %v568_v21 }
 0x30d   : > { %v632_v54 = vpop.permute.xlu1 %631 }
 0x30e   : > { %v653_v55 = vcombine.low %v628_v40, %v632_v54  ;;  %v654_v56 = vcombine.high %v628_v40, %v632_v54  ;;  %v602_v54 = vcombine.high %v576_v22, %v584_v23 }
 0x310   : > { %v661_v63 = vrot.slane %v653_v55, %v2179_v37  ;;  %v668_v1 = vrot.slane %v654_v56, %v2179_v37  ;;  %v617_v55 = vcombine.low %v593_v46, %v609_v48  ;;  %v618_v56 = vcombine.high %v593_v46, %v609_v48 }
 0x312   : > { %v669_v2 = vcombine.low %v645_v61, %v661_v63  ;;  %v670_v3 = vcombine.high %v645_v61, %v661_v63  ;;  %v685_v4 = vcombine.low %v652_v62, %v668_v1  ;;  %v686_v5 = vcombine.high %v652_v62, %v668_v1 }
 0x313   : > { %v621_v59 = vpack.c.bf16 %v617_v55, %v617_v55  ;;  %v622_v60 = vpack.c.bf16 %v618_v56, %v618_v56  ;;  %v600_v61 = vrot.slane %v586_v53, %v2189_v47  ;;  %v616_v62 = vrot.slane %v602_v54, %v2189_v47 }
 0x314   : > { %v677_v11 = vrot.slane %v669_v2, %v2189_v47  ;;  %v684_v12 = vrot.slane %v670_v3, %v2189_v47  ;;  %v693_v13 = vrot.slane %v685_v4, %v2189_v47  ;;  %v700_v14 = vrot.slane %v686_v5, %v2189_v47 }
 0x315   : > { %v619_v2 = vcombine.low %v600_v61, %v616_v62  ;;  %v620_v3 = vcombine.high %v600_v61, %v616_v62 }
 0x316   : > { %v705_v15 = vcombine.low %v677_v11, %v684_v12  ;;  %v1836_v16 = vcombine.high %v677_v11, %v684_v12  ;;  %v721_v17 = vcombine.low %v693_v13, %v700_v14  ;;  %v1837_v18 = vcombine.high %v693_v13, %v700_v14 }
 0x317   : > { %v623_v4 = vpack.c.bf16 %v619_v2, %v619_v2  ;;  %v624_v5 = vpack.c.bf16 %v620_v3, %v620_v3 }
 0x318   : > { %v712_v27 = vrot.slane %v705_v15, %v2179_v37  ;;  %v720_v28 = vrot.slane %v1836_v16, %v2179_v37  ;;  %v728_v29 = vrot.slane %v721_v17, %v2179_v37  ;;  %v736_v30 = vrot.slane %v1837_v18, %v2179_v37 }
 0x31a   : > { %v737_v31 = vcombine.low %v712_v27, %v720_v28  ;;  %v753_v32 = vcombine.low %v728_v29, %v736_v30  ;;  %v738_v33 = vcombine.high %v712_v27, %v720_v28  ;;  %v754_v34 = vcombine.high %v728_v29, %v736_v30 }
 0x31c   : > { %v745_v35 = vrot.slane %v737_v31, %v2189_v47  ;;  %v761_v36 = vrot.slane %v753_v32, %v2189_v47  ;;  %v752_v42 = vrot.slane %v738_v33, %v2189_v47  ;;  %v768_v43 = vrot.slane %v754_v34, %v2189_v47 }
 0x31e   : > { %v769_v40 = vcombine.low %v745_v35, %v761_v36  ;;  %v770_v41 = vcombine.high %v745_v35, %v761_v36  ;;  %v771_v51 = vcombine.low %v752_v42, %v768_v43  ;;  %v772_v52 = vcombine.high %v752_v42, %v768_v43 }
 0x320   : > { %v773_v44 = vpack.c.bf16 %v769_v40, %v769_v40  ;;  %v774_v45 = vpack.c.bf16 %v770_v41, %v770_v41  ;;  %v775_v57 = vpack.c.bf16 %v771_v51, %v771_v51  ;;  %v776_v58 = vpack.c.bf16 %v772_v52, %v772_v52 }
 0x322   : > { %v934_v49 = vsel %vm929_vm2, %v773_v44, 0  ;;  %v980_v50 = vsel %vm929_vm2, %v774_v45, 0  ;;  %v1026_v63 = vsel %vm929_vm2, %v775_v57, 0  ;;  %v1072_v1 = vsel %vm929_vm2, %v776_v58, 0 }
 0x323   : > { %1906 = vmatpush3.bf16.xpose.msra.mxu1 %v934_v49  ;;  %1912 = vmatpush3.bf16.xpose.msra.mxu0 %v980_v50 }
 0x324   : > { %1917 = vmatprep.subr.bf16.mxu1 %v2043_v8  ;;  %1923 = vmatprep.subr.bf16.mxu0 %v2043_v8 }
 0x32a   : > { %1908 = vmatmul.mubr.msk.bf16.vlgmr.msra.gmra.mrb[0].mxu1 %vm929_vm2, %v621_v59  ;;  %1914 = vmatmul.mubr.msk.bf16.vlgmr.msra.gmra.mrb[4].mxu0 %vm929_vm2, %v622_v60 }
 0x32b   : > { %1918 = vmatpush3.bf16.xpose.msra.mxu1 %v1026_v63  ;;  %1924 = vmatpush3.bf16.xpose.msra.mxu0 %v1072_v1 }
 0x32c   : > { %1919 = vmatprep.mubr.msk.bf16.mxu1 %vm2044_vm1, %v2043_v8  ;;  %1925 = vmatprep.mubr.msk.bf16.mxu0 %vm2044_vm1, %v2043_v8 }
 0x32d   : > { %1929 = vmatprep.subr.bf16.mxu1 %v2043_v8  ;;  %1935 = vmatprep.subr.bf16.mxu0 %v2043_v8 }
 0x332   : > { %1920 = vmatmul.mubr.msk.bf16.vlgmr.msra.gmra.mrb[4].mxu1 %vm929_vm2, %v623_v4  ;;  %1926 = vmatmul.mubr.msk.bf16.vlgmr.msra.gmra.mrb[8].mxu0 %vm929_vm2, %v624_v5 }
 0x333   : > { %1931 = vmatprep.mubr.msk.bf16.mxu1 %vm2044_vm1, %v2043_v8  ;;  %1937 = vmatprep.mubr.msk.bf16.mxu0 %vm2044_vm1, %v2043_v8 }
 0x3fd   : > { %v970_v6 = vpop.f32.mrb[0].mxu1  ;;  %v1016_v7 = vpop.f32.mrb[4].mxu0 }
 0x3fe   : > { %v1909_v9 = vpop.f32.mrb[1].mxu1  ;;  %v1915_v10 = vpop.f32.mrb[5].mxu0  ;;  %v1114_v11 = vsel %vm929_vm2, %v970_v6, -inf  ;;  %v1117_v12 = vsel %vm929_vm2, %v1016_v7, -inf }
 0x3ff   : > { %1115 = vmax.xlane.f32.xlu1 %v1114_v11  ;;  %v973_v13 = vpop.f32.mrb[2].mxu1  ;;  %1118 = vmax.xlane.f32.xlu0 %v1117_v12  ;;  %v1019_v14 = vpop.f32.mrb[6].mxu0 }
 0x400   : > { %v1910_v15 = vpop.f32.mrb[3].mxu1  ;;  %v1916_v16 = vpop.f32.mrb[7].mxu0 }
 0x405   : > { %v1062_v17 = vpop.f32.mrb[4].mxu1  ;;  %v1108_v18 = vpop.f32.mrb[8].mxu0 }
 0x406   : > { %v1921_v19 = vpop.f32.mrb[5].mxu1  ;;  %v1927_v21 = vpop.f32.mrb[9].mxu0  ;;  %v1120_v22 = vsel %vm929_vm2, %v1062_v17, -inf  ;;  %v1123_v23 = vsel %vm929_vm2, %v1108_v18, -inf }
 0x407   : > { %1121 = vmax.xlane.f32.xlu1 %v1120_v22  ;;  %v1065_v27 = vpop.f32.mrb[6].mxu1  ;;  %1124 = vmax.xlane.f32.xlu0 %v1123_v23  ;;  %v1111_v28 = vpop.f32.mrb[10].mxu0 }
 0x408   : > { %v1922_v29 = vpop.f32.mrb[7].mxu1  ;;  %v1928_v30 = vpop.f32.mrb[11].mxu0 }
 0x418   : > { %777 = vrot.lane.b32.xlu1 %v2160_v20, %s2051_s16 }
 0x48c   : > { %v1116_v31 = vpop.xlane.xlu1 %1115  ;;  %v1119_v32 = vpop.xlane.xlu0 %1118 }
 0x48d   : > { %v1126_v33 = vsub.f32 %v970_v6, %v1116_v31  ;;  %v1127_v34 = vsub.f32 %v1016_v7, %v1119_v32 }
 0x48f   : > { %v1130_v35 = vmul.f32 1.442695, %v1126_v33  ;;  %v1132_v36 = vmul.f32 1.442695, %v1127_v34 }
 0x491   : > { %2013 = vpow2.f32 %v1130_v35 }
 0x492   : > { %2015 = vpow2.f32 %v1132_v36 }
 0x494   : > { %v1122_v20 = vpop.xlane.xlu1 %1121  ;;  %v1125_v43 = vpop.xlane.xlu0 %1124 }
 0x495   : > { %v1128_v42 = vsub.f32 %v1062_v17, %v1122_v20  ;;  %v1129_v44 = vsub.f32 %v1108_v18, %v1125_v43 }
 0x497   : > { %v1134_v45 = vmul.f32 1.442695, %v1128_v42  ;;  %v1136_v46 = vmul.f32 1.442695, %v1129_v44 }
 0x499   : > { %2017 = vpow2.f32 %v1134_v45 }
 0x49a   : > { %2019 = vpow2.f32 %v1136_v46 }
 0x49b   : > { %v2244_v38 = vpop.eup %2013 }
 0x49c   : > { %v2246_v39 = vpop.eup %2015  ;;  %v1138_v40 = vsel %vm929_vm2, %v2244_v38, 0.0 }
 0x49d   : > { %1139 = vadd.xlane.f32.xlu1 %v1138_v40  ;;  %v1141_v41 = vsel %vm929_vm2, %v2246_v39, 0.0 }
 0x49e   : > { %1142 = vadd.xlane.f32.xlu0 %v1141_v41 }
 0x4a3   : > { %v2255_v48 = vpop.eup %2017 }
 0x4a4   : > { %v2257_v49 = vpop.eup %2019  ;;  %v1144_v50 = vsel %vm929_vm2, %v2255_v48, 0.0 }
 0x4ae   : > { %781 = vrot.lane.b32.xlu1 %v2169_v25, %s2051_s16  ;;  %v1147_v25 = vsel %vm929_vm2, %v2257_v49, 0.0 }
 0x4b2   : > { %783 = vrot.lane.b32.xlu1 %v2172_v26, %s2051_s16 }
 0x4b4   : > { %779 = vrot.lane.b32.xlu0 %v2166_v24, %s2051_s16  ;;  %v778_v24 = vpop.permute.xlu1 %777 }
 0x4d3   : > { %1145 = vadd.xlane.f32.xlu0 %v1144_v50 }
 0x4d6   : > { %1148 = vadd.xlane.f32.xlu1 %v1147_v25 }
 0x52a   : > { %v1140_v26 = vpop.xlane.xlu1 %1139 }
 0x52b   : > { %v1143_v51 = vpop.xlane.xlu0 %1142  ;;  %2021 = vrcp.f32 %v1140_v26 }
 0x52c   : > { %2023 = vrcp.f32 %v1143_v51 }
 0x52e   : > { %v782_v52 = vpop.permute.xlu1 %781 }
 0x52f   : > { %v789_v53 = vcombine.low %v778_v24, %v782_v52  ;;  %v790_v54 = vcombine.high %v778_v24, %v782_v52  ;;  %v780_v55 = vpop.permute.xlu0 %779 }
 0x531   : > { %v797_v59 = vrot.slane %v789_v53, %v2179_v37  ;;  %v804_v60 = vrot.slane %v790_v54, %v2179_v37 }
 0x532   : > { %v784_v56 = vpop.permute.xlu1 %783 }
 0x533   : > { %v805_v57 = vcombine.low %v780_v55, %v784_v56  ;;  %v806_v58 = vcombine.high %v780_v55, %v784_v56  ;;  %v2003_v55 = vld [vmem:[%s2387_s4] sm:$0xff]  }
 0x535   : > { %v813_v61 = vrot.slane %v805_v57, %v2179_v37  ;;  %v820_v62 = vrot.slane %v806_v58, %v2179_v37  ;;  %v2022_v27 = vpop.eup %2021 }
 0x536   : > { %v2024_v30 = vpop.eup %2023  ;;  %v1154_v35 = vmul.f32 %v2022_v27, %v2244_v38 }
 0x537   : > { %v821_v63 = vcombine.low %v797_v59, %v813_v61  ;;  %v822_v1 = vcombine.high %v797_v59, %v813_v61  ;;  %v837_v2 = vcombine.low %v804_v60, %v820_v62  ;;  %v838_v3 = vcombine.high %v804_v60, %v820_v62 }
 0x538   : > { %v1155_v36 = vmul.f32 %v2024_v30, %v2246_v39  ;;  %v1158_v45 = vpack.c.bf16 %v1154_v35, %v1154_v35 }
 0x539   : > { %v829_v4 = vrot.slane %v821_v63, %v2189_v47  ;;  %v836_v5 = vrot.slane %v822_v1, %v2189_v47  ;;  %v845_v6 = vrot.slane %v837_v2, %v2189_v47  ;;  %v852_v7 = vrot.slane %v838_v3, %v2189_v47 }
 0x53a   : > { %v1159_v46 = vpack.c.bf16 %v1155_v36, %v1155_v36 }
 0x53b   : > { %v857_v9 = vcombine.low %v829_v4, %v836_v5  ;;  %v1838_v10 = vcombine.high %v829_v4, %v836_v5  ;;  %v873_v11 = vcombine.low %v845_v6, %v852_v7  ;;  %v1839_v12 = vcombine.high %v845_v6, %v852_v7 }
 0x53d   : > { %v864_v13 = vrot.slane %v857_v9, %v2179_v37  ;;  %v872_v14 = vrot.slane %v1838_v10, %v2179_v37  ;;  %v880_v15 = vrot.slane %v873_v11, %v2179_v37  ;;  %v888_v16 = vrot.slane %v1839_v12, %v2179_v37 }
 0x53f   : > { %v889_v17 = vcombine.low %v864_v13, %v872_v14  ;;  %v890_v18 = vcombine.high %v864_v13, %v872_v14  ;;  %v905_v19 = vcombine.low %v880_v15, %v888_v16  ;;  %v906_v21 = vcombine.high %v880_v15, %v888_v16 }
 0x541   : > { %v897_v22 = vrot.slane %v889_v17, %v2189_v47  ;;  %v904_v23 = vrot.slane %v890_v18, %v2189_v47  ;;  %v913_v28 = vrot.slane %v905_v19, %v2189_v47  ;;  %v920_v29 = vrot.slane %v906_v21, %v2189_v47  ;;  %v2004_v21 = vld [vmem:[%s2387_s4 + $0x8] sm:$0xff]  }
 0x543   : > { %v921_v31 = vcombine.low %v897_v22, %v913_v28  ;;  %v922_v32 = vcombine.high %v897_v22, %v913_v28  ;;  %v923_v33 = vcombine.low %v904_v23, %v920_v29  ;;  %v924_v34 = vcombine.high %v904_v23, %v920_v29 }
 0x545   : > { %v925_v40 = vpack.c.bf16 %v921_v31, %v921_v31  ;;  %v926_v41 = vpack.c.bf16 %v922_v32, %v922_v32  ;;  %v927_v43 = vpack.c.bf16 %v923_v33, %v923_v33  ;;  %v928_v44 = vpack.c.bf16 %v924_v34, %v924_v34 }
 0x547   : > { %v1167_v20 = vsel %vm1165_vm3, %v925_v40, 0  ;;  %v1213_v42 = vsel %vm1165_vm3, %v926_v41, 0  ;;  %v1259_v38 = vsel %vm1165_vm3, %v927_v43, 0  ;;  %v1305_v39 = vsel %vm1165_vm3, %v928_v44, 0 }
 0x548   : > { %1930 = vmatpush3.bf16.msra.mxu1 %v1167_v20  ;;  %1936 = vmatpush3.bf16.msra.mxu0 %v1213_v42 }
 0x549   : > { %1941 = vmatprep.subr.bf16.mxu1 %v2043_v8  ;;  %1947 = vmatprep.subr.bf16.mxu0 %v2043_v8 }
 0x54b   : > { %1932 = vmatmul.mubr.msk.bf16.vlgmr.msra.gmra.mrb[8].mxu1 %vm929_vm2, %v1158_v45  ;;  %1938 = vmatmul.mubr.msk.bf16.vlgmr.msra.gmra.mrb[12].mxu0 %vm929_vm2, %v1159_v46 }
 0x54c   : > { %1942 = vmatpush3.bf16.msra.mxu1 %v1259_v38  ;;  %1948 = vmatpush3.bf16.msra.mxu0 %v1305_v39 }
 0x54d   : > { %1943 = vmatprep.mubr.msk.bf16.mxu1 %vm2044_vm1, %v2043_v8  ;;  %1949 = vmatprep.mubr.msk.bf16.mxu0 %vm2044_vm1, %v2043_v8 }
 0x54e   : > { %1953 = vmatprep.subr.bf16.mxu1 %v2043_v8  ;;  %1961 = vmatprep.subr.bf16.mxu0 %v2043_v8 }
 0x560   : > { %v1146_v50 = vpop.xlane.xlu0 %1145 }
 0x561   : > { %2025 = vrcp.f32 %v1146_v50 }
 0x563   : > { %v1149_v25 = vpop.xlane.xlu1 %1148 }
 0x564   : > { %2027 = vrcp.f32 %v1149_v25 }
 0x56b   : > { %v2026_v24 = vpop.eup %2025 }
 0x56c   : > { %v1156_v26 = vmul.f32 %v2026_v24, %v2255_v48 }
 0x56e   : > { %v2028_v51 = vpop.eup %2027  ;;  %v1160_v52 = vpack.c.bf16 %v1156_v26, %v1156_v26 }
 0x56f   : > { %v1157_v53 = vmul.f32 %v2028_v51, %v2257_v49 }
 0x570   : > { %1944 = vmatmul.mubr.msk.bf16.vlgmr.msra.gmra.mrb[12].mxu1 %vm929_vm2, %v1160_v52 }
 0x571   : > { %v1161_v54 = vpack.c.bf16 %v1157_v53, %v1157_v53  ;;  %1957 = vmatprep.mubr.msk.bf16.mxu1 %vm2044_vm1, %v2043_v8  ;;  %1954 = vmatpush3.bf16.msra.mxu1 %v2003_v55 }
 0x572   : > { %1955 = vmatprep.subr.bf16.mxu1 %v2043_v8 }
 0x573   : > { %1950 = vmatmul.mubr.msk.bf16.vlgmr.msra.gmra.mrb[16].mxu0 %vm929_vm2, %v1161_v54 }
 0x574   : > { %1965 = vmatprep.mubr.msk.bf16.mxu0 %vm2044_vm1, %v2043_v8 }
 0x575   : > { %1956 = vmatpush3.bf16.msra.mxu1 %v2004_v21 }
 0x576   : > { %1969 = vmatprep.subr.bf16.mxu1 %v2043_v8 }
 0x61e   : > { %v1203_v48 = vpop.f32.mrb[8].mxu1  ;;  %v1249_v49 = vpop.f32.mrb[12].mxu0 }
 0x61f   : > { %v1933_v56 = vpop.f32.mrb[9].mxu1  ;;  %v1939_v57 = vpop.f32.mrb[13].mxu0 }
 0x620   : > { %v1206_v58 = vpop.f32.mrb[10].mxu1  ;;  %v1252_v59 = vpop.f32.mrb[14].mxu0 }
 0x621   : > { %v1934_v60 = vpop.f32.mrb[11].mxu1  ;;  %v1940_v61 = vpop.f32.mrb[15].mxu0 }
 0x643   : > { %v1295_v62 = vpop.f32.mrb[12].mxu1 }
 0x644   : > { %v1347_v63 = vcombine.low %v1203_v48, %v1295_v62  ;;  %v1348_v1 = vcombine.high %v1203_v48, %v1295_v62  ;;  %v1945_v2 = vpop.f32.mrb[13].mxu1 }
 0x645   : > { %v1298_v3 = vpop.f32.mrb[14].mxu1 }
 0x646   : > { %v1946_v4 = vpop.f32.mrb[15].mxu1  ;;  %v1341_v5 = vpop.f32.mrb[16].mxu0  ;;  %v1355_v11 = vrot.slane %v1347_v63, %v2179_v37  ;;  %v1362_v12 = vrot.slane %v1348_v1, %v2179_v37  ;;  %v2006_v63 = vld [vmem:[%s2390_s7 + $0x8] sm:$0xff]  }
 0x647   : > { %v1363_v6 = vcombine.low %v1249_v49, %v1341_v5  ;;  %v1364_v7 = vcombine.high %v1249_v49, %v1341_v5  ;;  %v1951_v9 = vpop.f32.mrb[17].mxu0  ;;  %v1853_v5 = vld [vmem:[%s2388_s5] ss:$0 sm:$0xff] }
 0x648   : > { %v1344_v10 = vpop.f32.mrb[18].mxu0 }
 0x649   : > { %v1371_v13 = vrot.slane %v1363_v6, %v2179_v37  ;;  %v1378_v14 = vrot.slane %v1364_v7, %v2179_v37  ;;  %v1952_v15 = vpop.f32.mrb[19].mxu0  ;;  %v1854_v7 = vld [vmem:[%s2389_s6] ss:$0 sm:$0xff] }
 0x64a   : > { %v2010_v15 = vld [vmem:[%s2392_s9 + $0x18] sm:$0xff]  }
 0x64b   : > { %v1379_v16 = vcombine.low %v1355_v11, %v1371_v13  ;;  %v1380_v17 = vcombine.high %v1355_v11, %v1371_v13  ;;  %v1395_v18 = vcombine.low %v1362_v12, %v1378_v14  ;;  %v1396_v19 = vcombine.high %v1362_v12, %v1378_v14  ;;  %v2007_v12 = vld [vmem:[%s2392_s9] sm:$0xff]   ;;  %v2008_v13 = vld [vmem:[%s2392_s9 + $0x8] sm:$0xff]   ;;  %v2009_v14 = vld [vmem:[%s2392_s9 + $0x10] sm:$0xff]  }
 0x64d   : > { %v1387_v22 = vrot.slane %v1379_v16, %v2189_v47  ;;  %v1394_v23 = vrot.slane %v1380_v17, %v2189_v47  ;;  %v1403_v27 = vrot.slane %v1395_v18, %v2189_v47  ;;  %v1410_v28 = vrot.slane %v1396_v19, %v2189_v47  ;;  %v1855_v16 = vld [vmem:[%s2391_s8] ss:$0 sm:$0xff] }
 0x64f   : > { %v1415_v29 = vcombine.low %v1387_v22, %v1394_v23  ;;  %v1848_v30 = vcombine.high %v1387_v22, %v1394_v23  ;;  %v1431_v31 = vcombine.low %v1403_v27, %v1410_v28  ;;  %v1849_v32 = vcombine.high %v1403_v27, %v1410_v28 }
 0x651   : > { %v1422_v33 = vrot.slane %v1415_v29, %v2179_v37  ;;  %v1430_v34 = vrot.slane %v1848_v30, %v2179_v37  ;;  %v1438_v35 = vrot.slane %v1431_v31, %v2179_v37  ;;  %v1446_v36 = vrot.slane %v1849_v32, %v2179_v37 }
 0x653   : > { %v1448_v40 = vcombine.high %v1422_v33, %v1430_v34  ;;  %v1464_v41 = vcombine.high %v1438_v35, %v1446_v36  ;;  %v1447_v20 = vcombine.low %v1422_v33, %v1430_v34  ;;  %v1463_v42 = vcombine.low %v1438_v35, %v1446_v36 }
 0x655   : > { %v1462_v43 = vrot.slane %v1448_v40, %v2189_v47  ;;  %v1478_v44 = vrot.slane %v1464_v41, %v2189_v47  ;;  %v1455_v45 = vrot.slane %v1447_v20, %v2189_v47  ;;  %v1471_v46 = vrot.slane %v1463_v42, %v2189_v47 }
 0x657   : > { %v1481_v38 = vcombine.low %v1462_v43, %v1478_v44  ;;  %v1480_v39 = vcombine.high %v1455_v45, %v1471_v46  ;;  %v1482_v50 = vcombine.high %v1462_v43, %v1478_v44  ;;  %v1479_v25 = vcombine.low %v1455_v45, %v1471_v46 }
 0x659   : > { %1488 = vrot.lane.b32.xlu1 %v1481_v38, %s2052_s24  ;;  %1484 = vrot.lane.b32.xlu0 %v1480_v39, %s2053_s25 }
 0x65d   : > { %1492 = vrot.lane.b32.xlu0 %v1482_v50, %s2054_s26 }
 0x6cb   : > { %v1485_v37 = vpop.permute.xlu0 %1484  ;;  %v1489_v24 = vpop.permute.xlu1 %1488 }
 0x6cc   : > { %v1495_v26 = vsel %vm929_vm2, %v1479_v25, %v1485_v37 }
 0x6cd   : > { %v1497_v52 = vsel %vm1496_vm4, %v1495_v26, %v1489_v24  ;;  %v1859_v26 = vld [vmem:[%s2393_s10] ss:$0 sm:$0xff] }
 0x6cf   : > { %v1493_v51 = vpop.permute.xlu0 %1492 }
 0x6d0   : > { %v1499_v53 = vsel %vm1498_vm5, %v1497_v52, %v1493_v51 }
 0x6d1   : > { %v1500_v47 = vpack.c.bf16 %v1499_v53, %v1499_v53 }
 0x6d3   : > { %1958 = vmatmul.mubr.msk.bf16.vlgmr.msra.gmra.mrb[16].mxu1 %vm386_vm0, %v1500_v47 }
 0x6d4   : > { %1977 = vmatprep.mubr.msk.bf16.mxu1 %vm2044_vm1, %v2043_v8  ;;  %1970 = vmatpush3.bf16.msra.mxu1 %v2007_v12 }
 0x6d5   : > { %1971 = vmatprep.subr.bf16.mxu1 %v2043_v8 }
 0x6d8   : > { %1972 = vmatpush3.bf16.msra.mxu1 %v2008_v13 }
 0x6d9   : > { %1973 = vmatprep.subr.bf16.mxu1 %v2043_v8 }
 0x6dc   : > { %1974 = vmatpush3.bf16.msra.mxu1 %v2009_v14 }
 0x6dd   : > { %1975 = vmatprep.subr.bf16.mxu1 %v2043_v8 }
 0x6e0   : > { %1976 = vmatpush3.bf16.msra.mxu1 %v2010_v15 }
 0x7a6   : > { %v1554_v54 = vpop.f32.mrb[16].mxu1 }
 0x7a7   : > { %v2332_v55 = vadd.f32 %v1554_v54, %v2131_v0  ;;  %v1959_v48 = vpop.f32.mrb[17].mxu1  ;;  %v2005_v0 = vld [vmem:[%s2390_s7] sm:$0xff]  }
 0x7a8   : > { %v1557_v49 = vpop.f32.mrb[18].mxu1  ;;  %1962 = vmatpush3.bf16.msra.mxu0 %v2005_v0 }
 0x7a9   : > { %v1960_v56 = vpop.f32.mrb[19].mxu1  ;;  %v1562_v57 = vsel %vm386_vm0, %v2332_v55, 0.0  ;;  %1963 = vmatprep.subr.bf16.mxu0 %v2043_v8 }
 0x7aa   : > { %1563 = vadd.xlane.f32.xlu1 %v1562_v57 }
 0x7ac   : > { %1964 = vmatpush3.bf16.msra.mxu0 %v2006_v63 }
 0x837   : > { %v1564_v58 = vpop.xlane.xlu1 %1563 }
 0x838   : > { %v1565_v59 = vmul.f32 0.03125, %v1564_v58 }
 0x83a   : > { %v1566_v60 = vsub.f32 %v2332_v55, %v1565_v59 }
 0x83c   : > { %v1567_v61 = vmul.f32 %v1566_v60, %v1566_v60 }
 0x83e   : > { %v1568_v62 = vsel %vm386_vm0, %v1567_v61, 0.0 }
 0x83f   : > { %1569 = vadd.xlane.f32.xlu0 %v1568_v62 }
 0x8cc   : > { %v1570_v1 = vpop.xlane.xlu0 %1569 }
 0x8cd   : > { %v1571_v2 = vmul.f32 0.03125, %v1570_v1 }
 0x8cf   : > { %v1572_v3 = vadd.f32 1e-05, %v1571_v2 }
 0x8d1   : > { %2029 = vrsqrt.f32 %v1572_v3 }
 0x8db   : > { %v2030_v4 = vpop.eup %2029 }
 0x8dc   : > { %v1574_v6 = vmul.f32 %v2030_v4, %v1566_v60 }
 0x8de   : > { %v1581_v9 = vmul.f32 %v1853_v5, %v1574_v6 }
 0x8e0   : > { %v1588_v10 = vadd.f32 %v1854_v7, %v1581_v9 }
 0x8e2   : > { %v1589_v11 = vpack.c.bf16 %v1588_v10, %v1588_v10 }
 0x8e4   : > { %1966 = vmatmul.mubr.msk.bf16.vlgmr.msra.gmra.mrb[20].mxu0 %vm386_vm0, %v1589_v11 }
 0x9b7   : > { %v1650_v17 = vpop.f32.mrb[20].mxu0 }
 0x9b8   : > { %v1651_v18 = vadd.f32 %v1855_v16, %v1650_v17  ;;  %v1967_v19 = vpop.f32.mrb[21].mxu0 }
 0x9b9   : > { %v1653_v21 = vpop.f32.mrb[22].mxu0 }
 0x9ba   : > { %v1657_v22 = vmul.f32 0.70710677, %v1651_v18  ;;  %v1968_v23 = vpop.f32.mrb[23].mxu0  ;;  %v1656_v50 = vmul.f32 0.5, %v1651_v18 }
 0x9bc   : > { %v1658_v27 = vand.u32 2147483647, %v1657_v22  ;;  %vm1678_vm6 = vcmp.ge.f32.partialorder %v1657_v22, 0.0 }
 0x9be   : > { %v1659_v28 = vmul.f32 0.3275911, %v1658_v27  ;;  %v1672_v8 = vsub.f32 0.0, %v1658_v27 }
 0x9c0   : > { %v1660_v29 = vadd.f32 1.0, %v1659_v28  ;;  %v1673_v31 = vmul.f32 %v1672_v8, %v1658_v27 }
 0x9c2   : > { %2031 = vrcp.f32 %v1660_v29  ;;  %v1674_v34 = vmul.f32 1.442695, %v1673_v31 }
 0x9c4   : > { %2033 = vpow2.f32 %v1674_v34 }
 0x9cc   : > { %v2032_v30 = vpop.eup %2031 }
 0x9cd   : > { %v1663_v32 = vmul.f32 1.0614054, %v2032_v30 }
 0x9ce   : > { %v2034_v44 = vpop.eup %2033 }
 0x9cf   : > { %v1664_v33 = vadd.f32 -1.4531521, %v1663_v32 }
 0x9d1   : > { %v1665_v35 = vmul.f32 %v2032_v30, %v1664_v33 }
 0x9d3   : > { %v1666_v36 = vadd.f32 1.4214138, %v1665_v35 }
 0x9d5   : > { %v1667_v40 = vmul.f32 %v2032_v30, %v1666_v36 }
 0x9d7   : > { %v1668_v41 = vadd.f32 -0.28449672, %v1667_v40 }
 0x9d9   : > { %v1669_v20 = vmul.f32 %v2032_v30, %v1668_v41 }
 0x9db   : > { %v1670_v42 = vadd.f32 0.2548296, %v1669_v20 }
 0x9dd   : > { %v1671_v43 = vmul.f32 %v2032_v30, %v1670_v42 }
 0x9df   : > { %v1676_v45 = vmul.f32 %v2034_v44, %v1671_v43 }
 0x9e1   : > { %v1677_v46 = vsub.f32 1.0, %v1676_v45 }
 0x9e3   : > { %v1679_v38 = vsub.f32 0.0, %v1677_v46 }
 0x9e5   : > { %v1680_v39 = vsel %vm1678_vm6, %v1677_v46, %v1679_v38 }
 0x9e6   : > { %v1681_v25 = vadd.f32 1.0, %v1680_v39 }
 0x9e8   : > { %v1682_v37 = vmul.f32 %v1681_v25, %v1656_v50 }
 0x9ea   : > { %v1683_v24 = vpack.c.bf16 %v1682_v37, %v1682_v37 }
 0x9ec   : > { %1978 = vmatmul.mubr.msk.bf16.vlgmr.msra.gmra.mrb[20].mxu1 %vm1723_vm7, %v1683_v24 }
 0xabf   : > { %v1761_v51 = vpop.f32.mrb[20].mxu1 }
 0xac0   : > { %v1762_v52 = vadd.f32 %v1859_v26, %v1761_v51  ;;  %v1979_v53 = vpop.f32.mrb[21].mxu1 }
 0xac1   : > { %v1764_v47 = vpop.f32.mrb[22].mxu1 }
 0xac2   : > { %v1767_v54 = vadd.f32 %v1762_v52, %v2332_v55  ;;  %v1980_v48 = vpop.f32.mrb[23].mxu1 }
 0xac4   : > { %1768 = vst.msk [vmem:[%s381_s14] sm:$0xff] %vm386_vm0, %v1767_v54 }
 0xac5 PF: > { %s21_s17 = sadd.s32 1, %s2041_s17  }
 0xac6   : > { %p18_p4 = scmp.ge.s32.totalorder %s21_s17, 4  }
 0xac8   :  { %20 = sbr.rel (!%p18_p4) target bundleno = 1 (0x1), region = 94 }

// kernel: transformer_encoder.3
= control target key start
LH: loop header
LB: loop body
LE: loop exit
PB: predicated region body
PF: predicated region fallthrough
CT: control target
= control target key end

     0   :  { %s2568_s0 = inlined_call_operand.vmem [shape: f32[2,8,32], index: 0, kind: input, shape index: {}]   ;;  %s2569_s1 = inlined_call_operand.vmem [shape: f32[1,32], index: 1, kind: input, shape index: {}]   ;;  %s2570_s2 = inlined_call_operand.vmem [shape: f32[1,32], index: 2, kind: input, shape index: {}]   ;;  %s2571_s3 = inlined_call_operand.vmem [shape: bf16[32,96], index: 3, kind: input, shape index: {}]   ;;  %s2572_s4 = inlined_call_operand.vmem [shape: bf16[32,32], index: 4, kind: input, shape index: {}]   ;;  %s2573_s5 = inlined_call_operand.vmem [shape: f32[1,32], index: 5, kind: input, shape index: {}]   ;;  %s2574_s6 = inlined_call_operand.vmem [shape: f32[1,32], index: 6, kind: input, shape index: {}]   ;;  %s2575_s7 = inlined_call_operand.vmem [shape: bf16[32,64], index: 7, kind: input, shape index: {}]   ;;  %s2576_s8 = inlined_call_operand.vmem [shape: f32[1,64], index: 8, kind: input, shape index: {}]   ;;  %s2577_s9 = inlined_call_operand.vmem [shape: bf16[64,32], index: 9, kind: input, shape index: {}]   ;;  %s2578_s10 = inlined_call_operand.vmem [shape: f32[1,32], index: 10, kind: input, shape index: {}]   ;;  %s2579_s11 = inlined_call_operand.hbm [shape: f32[2,8,32], index: 11, kind: output, shape index: {}]  }
   0x1   :  { %2580 = sst [smem:[#allocation5_spill]] %s2568_s0 }
   0x2   :  { %16 = vsyncpa [#allocation3], 0 }
   0x3   :  { %18 = vsyncpa [#allocation3 + $0x1], 0  ;;  %s2224_s17 = smov 0   ;;  %s2226_s18 = smov 0  }
   0x4   :  { %s2228_s19 = smov 0   ;;  %s2230_s20 = smov 0  }
   0x5 LB: > { %s2245_s21 = sadd.s32 4294967295, %s2149_s20   ;;  %s1842_s22 = sadd.s32 4294967294, %s2149_s20   ;;  %s2149_s20 = sphi %s2230_s20, %s2587_s20   ;;  %s2145_s19 = sphi %s2228_s19, %s2586_s19   ;;  %s2141_s18 = sphi %s2226_s18, %s2585_s18   ;;  %s2137_s17 = sphi %s2224_s17, %s2584_s17  }
   0x6   : > { %s2249_s23 = sadd.s32 1, %s2149_s20   ;;  %s267_s24 = sadd.s32 1, %s2145_s19 }
   0x7   : > { %s264_s25 = ssub.s32 %s2149_s20, %s2249_s23  ;;  %p277_p0 = scmp.ne.s32.totalorder %s2145_s19, %s2141_s18 }
   0x8   : > { %p265_p1 = scmp.eq.s32.totalorder %s264_s25, 0  ;;  %p278_p2 = scmp.eq.s32.totalorder %s2245_s21, 1 }
   0x9   : > { %p283_p3 = scmp.ne.s32.totalorder %s2141_s18, %s2137_s17  ;;  %p284_p4 = scmp.eq.s32.totalorder %s1842_s22, 1 }
   0xa   : > { %s2260_s26 = scalar_select %p265_p1, %s2145_s19, %s267_s24  }
   0xb   : > { %p2262_p5 = por %p278_p2, %p277_p0  ;;  %p2266_p6 = por %p284_p4, %p283_p3 }
   0xc   : > { %p1845_p7 = scmp.ge.s32.totalorder %s2149_s20, 1  ;;  %p339_p8 = scmp.lt.s32.totalorder %s2149_s20, 3 }
   0xe   : > { %p340_p9 = pnand %p1845_p7, %p339_p8 }
   0xf   : > { %p378_p10 = scmp.lt.s32.totalorder (!%p340_p9), %s2245_s21, 1  ;;  %vm386_vm0 = vcmask (!%p340_p9), 261120   ;;  %s2583_s0 = sld [smem:[#allocation5_spill]] (!%p340_p9)  ;;  %v2053_v7 = vld [vmem:[%s2571_s3] sm:$0xff] (!%p340_p9)   ;;  %v2151_v8 = vmov (!%p340_p9), 0.0   ;;  %vm2152_vm1 = vmmov (!%p340_p9), 0   ;;  %v490_v29 = vlaneseq (!%p340_p9) }
  0x10   : > { %343 = sbr.rel (%p340_p9) target bundleno = 2781 (0xadd), region = 64  ;;  %1918 = vmatprep.subr.bf16.mxu0 (!%p340_p9), %v2151_v8  ;;  %1922 = vmatprep.mubr.msk.bf16.mxu0 (!%p340_p9), %vm2152_vm1, %v2151_v8  ;;  %v2054_v9 = vld [vmem:[%s2571_s3 + $0x8] sm:$0xff] (!%p340_p9)   ;;  %v1848_v14 = vld [vmem:[%s2569_s1] ss:$0 sm:$0xff] (!%p340_p9)  ;;  %s2153_s13 = smov (!%p340_p9), 104   ;;  %vm929_vm2 = vcmask (!%p340_p9), 64512  }
  0x11   : > { %1919 = vmatpush3.bf16.msra.mxu0 (!%p340_p9), %v2053_v7  ;;  %1926 = vmatprep.subr.bf16.mxu1 (!%p340_p9), %v2151_v8  ;;  %v1849_v16 = vld [vmem:[%s2570_s2] ss:$0 sm:$0xff] (!%p340_p9)  ;;  %s2155_s15 = smov (!%p340_p9), 112   ;;  %s2156_s16 = smov (!%p340_p9), 96   ;;  %v2157_v27 = vmov (!%p340_p9), 1983009808  }
  0x12   : > { %1920 = vmatprep.subr.bf16.mxu0 (!%p340_p9), %v2151_v8  ;;  %1928 = vmatprep.mubr.msk.bf16.mxu1 (!%p340_p9), %vm2152_vm1, %v2151_v8  ;;  %v488_v28 = vunpack.c.l.s4 (!%p340_p9), %v2157_v27  ;;  %v491_v31 = vshrl.u32 (!%p340_p9), %v490_v29, 7  ;;  %v2158_v33 = vmov (!%p340_p9), 1934713408   ;;  %s2159_s22 = smov (!%p340_p9), 64   ;;  %vm1165_vm3 = vcmask (!%p340_p9), 1043456   ;;  %s2160_s12 = smov (!%p340_p9), 16  }
  0x13   : > { %v520_v34 = vunpack.c.l.s4 (!%p340_p9), %v2158_v33  ;;  %vm1496_vm4 = vcmask (!%p340_p9), 130048   ;;  %vm1498_vm5 = vcmask (!%p340_p9), 195584   ;;  %vm1723_vm7 = vcmask (!%p340_p9), 523264  }
  0x14   : > { %v489_v30 = vunpack.c.0.s8 (!%p340_p9), %v488_v28 }
  0x15   : > { %1921 = vmatpush3.bf16.msra.mxu0 (!%p340_p9), %v2054_v9  ;;  %v521_v41 = vunpack.c.0.s8 (!%p340_p9), %v520_v34 }
  0x16   : > { %1932 = vmatprep.subr.bf16.mxu0 (!%p340_p9), %v2151_v8  ;;  %v2325_v37 = vsub.s32 (!%p340_p9), %v489_v30, %v491_v31 }
  0x17   : > { %s379_s29 = scalar_select %p378_p10, %s2245_s21, 1  ;;  %v2335_v47 = vsub.s32 %v521_v41, %v491_v31 }
  0x19   : > { %s1847_s30 = sshll.u32 %s379_s29, 3 }
  0x1a   : > { %s381_s14 = scalar_lea.vmem %s2583_s0, %s1847_s30 }
  0x1b   : > { %v2277_v0 = vld [vmem:[%s381_s14] sm:$0xff]  ;;  %s2154_s14 = smov 120  }
  0x1c   : > { %v387_v1 = vsel %vm386_vm0, %v2277_v0, 0.0 }
  0x1d   : > { %388 = vadd.xlane.f32.xlu0 %v387_v1 }
  0xaa   : > { %v389_v2 = vpop.xlane.xlu0 %388 }
  0xab   : > { %v391_v3 = vmul.f32 0.03125, %v389_v2 }
  0xad   : > { %v392_v4 = vsub.f32 %v2277_v0, %v391_v3 }
  0xaf   : > { %v393_v5 = vmul.f32 %v392_v4, %v392_v4 }
  0xb1   : > { %v394_v6 = vsel %vm386_vm0, %v393_v5, 0.0 }
  0xb2   : > { %395 = vadd.xlane.f32.xlu0 %v394_v6 }
 0x13f   : > { %v396_v10 = vpop.xlane.xlu0 %395 }
 0x140   : > { %v397_v11 = vmul.f32 0.03125, %v396_v10 }
 0x142   : > { %v398_v12 = vadd.f32 1e-05, %v397_v11 }
 0x144   : > { %2063 = vrsqrt.f32 %v398_v12 }
 0x14e   : > { %v2064_v13 = vpop.eup %2063 }
 0x14f   : > { %v400_v15 = vmul.f32 %v2064_v13, %v392_v4 }
 0x151   : > { %v407_v17 = vmul.f32 %v1848_v14, %v400_v15 }
 0x153   : > { %v414_v18 = vadd.f32 %v1849_v16, %v407_v17 }
 0x155   : > { %v415_v19 = vpack.c.bf16 %v414_v18, %v414_v18 }
 0x157   : > { %1923 = vmatmul.mubr.msk.bf16.vlgmr.msra.gmra.mrb[0].mxu0 %vm386_vm0, %v415_v19 }
 0x158   : > { %1934 = vmatprep.mubr.msk.bf16.mxu0 %vm2152_vm1, %v2151_v8 }
 0x22a   : > { %v2306_v20 = vpop.f32.mrb[0].mxu0 }
 0x22b   : > { %482 = vrot.lane.b32.xlu0 %v2306_v20, %s2153_s13  ;;  %476 = vrot.lane.b32.xlu1 %v2306_v20, %s2154_s14  ;;  %v1924_v21 = vpop.f32.mrb[1].mxu0  ;;  %s2161_s13 = smov 8   ;;  %s2162_s14 = smov 24  }
 0x22c   : > { %v472_v22 = vpop.f32.mrb[2].mxu0 }
 0x22d   : > { %v1925_v23 = vpop.f32.mrb[3].mxu0 }
 0x22f   : > { %479 = vrot.lane.b32.xlu1 %v2306_v20, %s2155_s15  ;;  %s2163_s15 = smov [#allocation2]  }
 0x233   : > { %625 = vrot.lane.b32.xlu1 %v2306_v20, %s2156_s16 }
 0x29d   : > { %v2312_v24 = vpop.permute.xlu1 %476  ;;  %v2318_v26 = vpop.permute.xlu0 %482 }
 0x29e   : > { %627 = vrot.lane.b32.xlu1 %v2312_v24, %s2156_s16  ;;  %v501_v38 = vcombine.low %v2312_v24, %v2318_v26  ;;  %v502_v39 = vcombine.high %v2312_v24, %v2318_v26 }
 0x2a0   : > { %v509_v44 = vrot.slane %v501_v38, %v2325_v37  ;;  %v516_v45 = vrot.slane %v502_v39, %v2325_v37 }
 0x2a1   : > { %v2315_v25 = vpop.permute.xlu1 %479 }
 0x2a2   : > { %629 = vrot.lane.b32.xlu1 %v2315_v25, %s2156_s16  ;;  %v485_v35 = vcombine.low %v2306_v20, %v2315_v25  ;;  %v486_v36 = vcombine.high %v2306_v20, %v2315_v25 }
 0x2a4   : > { %v493_v42 = vrot.slane %v485_v35, %v2325_v37  ;;  %v500_v43 = vrot.slane %v486_v36, %v2325_v37 }
 0x2a5   : > { %v626_v32 = vpop.permute.xlu1 %625 }
 0x2a6   : > { %631 = vrot.lane.b32.xlu1 %v2318_v26, %s2156_s16  ;;  %v517_v48 = vcombine.low %v493_v42, %v509_v44  ;;  %v518_v49 = vcombine.high %v493_v42, %v509_v44  ;;  %v533_v50 = vcombine.low %v500_v43, %v516_v45  ;;  %v534_v51 = vcombine.high %v500_v43, %v516_v45  ;;  %s2091_s16 = sshll.u32 %s2163_s15, 4  ;;  %s2092_s16 = int_to_ptr.vmem [resolvable:$false] %s2091_s16 }
 0x2a7   : > { %s2093_s0 = scalar_lea.vmem %s2092_s16, 256 }
 0x2a8   : > { %v525_v57 = vrot.slane %v517_v48, %v2335_v47  ;;  %v532_v58 = vrot.slane %v518_v49, %v2335_v47  ;;  %v541_v59 = vrot.slane %v533_v50, %v2335_v47  ;;  %v548_v60 = vrot.slane %v534_v51, %v2335_v47 }
 0x2aa   : > { %v553_v6 = vcombine.low %v525_v57, %v532_v58  ;;  %v1853_v7 = vcombine.high %v525_v57, %v532_v58  ;;  %v569_v9 = vcombine.low %v541_v59, %v548_v60  ;;  %v1854_v10 = vcombine.high %v541_v59, %v548_v60 }
 0x2ac   : > { %v560_v19 = vrot.slane %v553_v6, %v2325_v37  ;;  %v568_v21 = vrot.slane %v1853_v7, %v2325_v37  ;;  %v576_v22 = vrot.slane %v569_v9, %v2325_v37  ;;  %v584_v23 = vrot.slane %v1854_v10, %v2325_v37 }
 0x2ae   : > { %v585_v38 = vcombine.low %v560_v19, %v568_v21  ;;  %v601_v39 = vcombine.low %v576_v22, %v584_v23 }
 0x2b0   : > { %v609_v48 = vrot.slane %v601_v39, %v2335_v47 }
 0x310   : > { %v628_v40 = vpop.permute.xlu1 %627 }
 0x314   : > { %v630_v46 = vpop.permute.xlu1 %629 }
 0x315   : > { %v637_v52 = vcombine.low %v626_v32, %v630_v46  ;;  %v638_v53 = vcombine.high %v626_v32, %v630_v46  ;;  %v593_v46 = vrot.slane %v585_v38, %v2335_v47 }
 0x317   : > { %v645_v61 = vrot.slane %v637_v52, %v2325_v37  ;;  %v652_v62 = vrot.slane %v638_v53, %v2325_v37  ;;  %v586_v53 = vcombine.high %v560_v19, %v568_v21 }
 0x318   : > { %v632_v54 = vpop.permute.xlu1 %631 }
 0x319   : > { %v653_v55 = vcombine.low %v628_v40, %v632_v54  ;;  %v654_v56 = vcombine.high %v628_v40, %v632_v54  ;;  %v602_v54 = vcombine.high %v576_v22, %v584_v23 }
 0x31b   : > { %v661_v63 = vrot.slane %v653_v55, %v2325_v37  ;;  %v668_v1 = vrot.slane %v654_v56, %v2325_v37  ;;  %v617_v55 = vcombine.low %v593_v46, %v609_v48  ;;  %v618_v56 = vcombine.high %v593_v46, %v609_v48 }
 0x31d   : > { %v669_v2 = vcombine.low %v645_v61, %v661_v63  ;;  %v670_v3 = vcombine.high %v645_v61, %v661_v63  ;;  %v685_v4 = vcombine.low %v652_v62, %v668_v1  ;;  %v686_v5 = vcombine.high %v652_v62, %v668_v1 }
 0x31e   : > { %v621_v59 = vpack.c.bf16 %v617_v55, %v617_v55  ;;  %v622_v60 = vpack.c.bf16 %v618_v56, %v618_v56  ;;  %v600_v61 = vrot.slane %v586_v53, %v2335_v47  ;;  %v616_v62 = vrot.slane %v602_v54, %v2335_v47 }
 0x31f   : > { %v677_v11 = vrot.slane %v669_v2, %v2335_v47  ;;  %v684_v12 = vrot.slane %v670_v3, %v2335_v47  ;;  %v693_v13 = vrot.slane %v685_v4, %v2335_v47  ;;  %v700_v14 = vrot.slane %v686_v5, %v2335_v47 }
 0x320   : > { %v619_v2 = vcombine.low %v600_v61, %v616_v62  ;;  %v620_v3 = vcombine.high %v600_v61, %v616_v62 }
 0x321   : > { %v705_v15 = vcombine.low %v677_v11, %v684_v12  ;;  %v1855_v16 = vcombine.high %v677_v11, %v684_v12  ;;  %v721_v17 = vcombine.low %v693_v13, %v700_v14  ;;  %v1856_v18 = vcombine.high %v693_v13, %v700_v14 }
 0x322   : > { %v623_v4 = vpack.c.bf16 %v619_v2, %v619_v2  ;;  %v624_v5 = vpack.c.bf16 %v620_v3, %v620_v3 }
 0x323   : > { %v712_v27 = vrot.slane %v705_v15, %v2325_v37  ;;  %v720_v28 = vrot.slane %v1855_v16, %v2325_v37  ;;  %v728_v29 = vrot.slane %v721_v17, %v2325_v37  ;;  %v736_v30 = vrot.slane %v1856_v18, %v2325_v37 }
 0x325   : > { %v737_v31 = vcombine.low %v712_v27, %v720_v28  ;;  %v753_v32 = vcombine.low %v728_v29, %v736_v30  ;;  %v738_v33 = vcombine.high %v712_v27, %v720_v28  ;;  %v754_v34 = vcombine.high %v728_v29, %v736_v30 }
 0x327   : > { %v745_v35 = vrot.slane %v737_v31, %v2335_v47  ;;  %v761_v36 = vrot.slane %v753_v32, %v2335_v47  ;;  %v752_v42 = vrot.slane %v738_v33, %v2335_v47  ;;  %v768_v43 = vrot.slane %v754_v34, %v2335_v47 }
 0x329   : > { %v769_v40 = vcombine.low %v745_v35, %v761_v36  ;;  %v770_v41 = vcombine.high %v745_v35, %v761_v36  ;;  %v771_v51 = vcombine.low %v752_v42, %v768_v43  ;;  %v772_v52 = vcombine.high %v752_v42, %v768_v43 }
 0x32b   : > { %v773_v44 = vpack.c.bf16 %v769_v40, %v769_v40  ;;  %v774_v45 = vpack.c.bf16 %v770_v41, %v770_v41  ;;  %v775_v57 = vpack.c.bf16 %v771_v51, %v771_v51  ;;  %v776_v58 = vpack.c.bf16 %v772_v52, %v772_v52 }
 0x32d   : > { %v934_v49 = vsel %vm929_vm2, %v773_v44, 0  ;;  %v980_v50 = vsel %vm929_vm2, %v774_v45, 0  ;;  %v1026_v63 = vsel %vm929_vm2, %v775_v57, 0  ;;  %v1072_v1 = vsel %vm929_vm2, %v776_v58, 0 }
 0x32e   : > { %1927 = vmatpush3.bf16.xpose.msra.mxu1 %v934_v49  ;;  %1933 = vmatpush3.bf16.xpose.msra.mxu0 %v980_v50 }
 0x32f   : > { %1938 = vmatprep.subr.bf16.mxu1 %v2151_v8  ;;  %1944 = vmatprep.subr.bf16.mxu0 %v2151_v8 }
 0x335   : > { %1929 = vmatmul.mubr.msk.bf16.vlgmr.msra.gmra.mrb[0].mxu1 %vm929_vm2, %v621_v59  ;;  %1935 = vmatmul.mubr.msk.bf16.vlgmr.msra.gmra.mrb[4].mxu0 %vm929_vm2, %v622_v60 }
 0x336   : > { %1939 = vmatpush3.bf16.xpose.msra.mxu1 %v1026_v63  ;;  %1945 = vmatpush3.bf16.xpose.msra.mxu0 %v1072_v1 }
 0x337   : > { %1940 = vmatprep.mubr.msk.bf16.mxu1 %vm2152_vm1, %v2151_v8  ;;  %1946 = vmatprep.mubr.msk.bf16.mxu0 %vm2152_vm1, %v2151_v8 }
 0x338   : > { %1950 = vmatprep.subr.bf16.mxu1 %v2151_v8  ;;  %1956 = vmatprep.subr.bf16.mxu0 %v2151_v8 }
 0x33d   : > { %1941 = vmatmul.mubr.msk.bf16.vlgmr.msra.gmra.mrb[4].mxu1 %vm929_vm2, %v623_v4  ;;  %1947 = vmatmul.mubr.msk.bf16.vlgmr.msra.gmra.mrb[8].mxu0 %vm929_vm2, %v624_v5 }
 0x33e   : > { %1952 = vmatprep.mubr.msk.bf16.mxu1 %vm2152_vm1, %v2151_v8  ;;  %1958 = vmatprep.mubr.msk.bf16.mxu0 %vm2152_vm1, %v2151_v8 }
 0x408   : > { %v970_v6 = vpop.f32.mrb[0].mxu1  ;;  %v1016_v7 = vpop.f32.mrb[4].mxu0 }
 0x409   : > { %v1930_v9 = vpop.f32.mrb[1].mxu1  ;;  %v1936_v10 = vpop.f32.mrb[5].mxu0  ;;  %v1114_v11 = vsel %vm929_vm2, %v970_v6, -inf  ;;  %v1117_v12 = vsel %vm929_vm2, %v1016_v7, -inf }
 0x40a   : > { %1115 = vmax.xlane.f32.xlu1 %v1114_v11  ;;  %v973_v13 = vpop.f32.mrb[2].mxu1  ;;  %1118 = vmax.xlane.f32.xlu0 %v1117_v12  ;;  %v1019_v14 = vpop.f32.mrb[6].mxu0 }
 0x40b   : > { %v1931_v15 = vpop.f32.mrb[3].mxu1  ;;  %v1937_v16 = vpop.f32.mrb[7].mxu0 }
 0x410   : > { %v1062_v17 = vpop.f32.mrb[4].mxu1  ;;  %v1108_v18 = vpop.f32.mrb[8].mxu0 }
 0x411   : > { %v1942_v19 = vpop.f32.mrb[5].mxu1  ;;  %v1948_v21 = vpop.f32.mrb[9].mxu0  ;;  %v1120_v22 = vsel %vm929_vm2, %v1062_v17, -inf  ;;  %v1123_v23 = vsel %vm929_vm2, %v1108_v18, -inf }
 0x412   : > { %1121 = vmax.xlane.f32.xlu1 %v1120_v22  ;;  %v1065_v27 = vpop.f32.mrb[6].mxu1  ;;  %1124 = vmax.xlane.f32.xlu0 %v1123_v23  ;;  %v1111_v28 = vpop.f32.mrb[10].mxu0 }
 0x413   : > { %v1943_v29 = vpop.f32.mrb[7].mxu1  ;;  %v1949_v30 = vpop.f32.mrb[11].mxu0 }
 0x423   : > { %777 = vrot.lane.b32.xlu1 %v2306_v20, %s2159_s22 }
 0x497   : > { %v1116_v31 = vpop.xlane.xlu1 %1115  ;;  %v1119_v32 = vpop.xlane.xlu0 %1118 }
 0x498   : > { %v1126_v33 = vsub.f32 %v970_v6, %v1116_v31  ;;  %v1127_v34 = vsub.f32 %v1016_v7, %v1119_v32 }
 0x49a   : > { %v1130_v35 = vmul.f32 1.442695, %v1126_v33  ;;  %v1132_v36 = vmul.f32 1.442695, %v1127_v34 }
 0x49c   : > { %2065 = vpow2.f32 %v1130_v35 }
 0x49d   : > { %2067 = vpow2.f32 %v1132_v36 }
 0x49f   : > { %v1122_v20 = vpop.xlane.xlu1 %1121  ;;  %v1125_v43 = vpop.xlane.xlu0 %1124 }
 0x4a0   : > { %v1128_v42 = vsub.f32 %v1062_v17, %v1122_v20  ;;  %v1129_v44 = vsub.f32 %v1108_v18, %v1125_v43 }
 0x4a2   : > { %v1134_v45 = vmul.f32 1.442695, %v1128_v42  ;;  %v1136_v46 = vmul.f32 1.442695, %v1129_v44 }
 0x4a4   : > { %2069 = vpow2.f32 %v1134_v45 }
 0x4a5   : > { %2071 = vpow2.f32 %v1136_v46 }
 0x4a6   : > { %v2390_v38 = vpop.eup %2065 }
 0x4a7   : > { %v2392_v39 = vpop.eup %2067  ;;  %v1138_v40 = vsel %vm929_vm2, %v2390_v38, 0.0 }
 0x4a8   : > { %1139 = vadd.xlane.f32.xlu1 %v1138_v40  ;;  %v1141_v41 = vsel %vm929_vm2, %v2392_v39, 0.0 }
 0x4a9   : > { %1142 = vadd.xlane.f32.xlu0 %v1141_v41 }
 0x4ae   : > { %v2401_v48 = vpop.eup %2069 }
 0x4af   : > { %v2403_v49 = vpop.eup %2071  ;;  %v1144_v50 = vsel %vm929_vm2, %v2401_v48, 0.0 }
 0x4b9   : > { %781 = vrot.lane.b32.xlu1 %v2315_v25, %s2159_s22  ;;  %v1147_v25 = vsel %vm929_vm2, %v2403_v49, 0.0 }
 0x4bd   : > { %783 = vrot.lane.b32.xlu1 %v2318_v26, %s2159_s22 }
 0x4bf   : > { %779 = vrot.lane.b32.xlu0 %v2312_v24, %s2159_s22  ;;  %v778_v24 = vpop.permute.xlu1 %777  ;;  %s1885_s22 = sshll.u32 %s2245_s21, 7 }
 0x4de   : > { %1145 = vadd.xlane.f32.xlu0 %v1144_v50 }
 0x4e1   : > { %1148 = vadd.xlane.f32.xlu1 %v1147_v25 }
 0x535   : > { %v1140_v26 = vpop.xlane.xlu1 %1139 }
 0x536   : > { %v1143_v51 = vpop.xlane.xlu0 %1142  ;;  %2073 = vrcp.f32 %v1140_v26 }
 0x537   : > { %2075 = vrcp.f32 %v1143_v51 }
 0x539   : > { %v782_v52 = vpop.permute.xlu1 %781 }
 0x53a   : > { %v789_v53 = vcombine.low %v778_v24, %v782_v52  ;;  %v790_v54 = vcombine.high %v778_v24, %v782_v52  ;;  %v780_v55 = vpop.permute.xlu0 %779 }
 0x53c   : > { %v797_v59 = vrot.slane %v789_v53, %v2325_v37  ;;  %v804_v60 = vrot.slane %v790_v54, %v2325_v37 }
 0x53d   : > { %v784_v56 = vpop.permute.xlu1 %783 }
 0x53e   : > { %v805_v57 = vcombine.low %v780_v55, %v784_v56  ;;  %v806_v58 = vcombine.high %v780_v55, %v784_v56  ;;  %v2055_v55 = vld [vmem:[%s2572_s4] sm:$0xff]  }
 0x540   : > { %v813_v61 = vrot.slane %v805_v57, %v2325_v37  ;;  %v820_v62 = vrot.slane %v806_v58, %v2325_v37  ;;  %v2074_v27 = vpop.eup %2073 }
 0x541   : > { %v2076_v30 = vpop.eup %2075  ;;  %v1154_v35 = vmul.f32 %v2074_v27, %v2390_v38 }
 0x542   : > { %v821_v63 = vcombine.low %v797_v59, %v813_v61  ;;  %v822_v1 = vcombine.high %v797_v59, %v813_v61  ;;  %v837_v2 = vcombine.low %v804_v60, %v820_v62  ;;  %v838_v3 = vcombine.high %v804_v60, %v820_v62 }
 0x543   : > { %v1155_v36 = vmul.f32 %v2076_v30, %v2392_v39  ;;  %v1158_v45 = vpack.c.bf16 %v1154_v35, %v1154_v35 }
 0x544   : > { %v829_v4 = vrot.slane %v821_v63, %v2335_v47  ;;  %v836_v5 = vrot.slane %v822_v1, %v2335_v47  ;;  %v845_v6 = vrot.slane %v837_v2, %v2335_v47  ;;  %v852_v7 = vrot.slane %v838_v3, %v2335_v47 }
 0x545   : > { %v1159_v46 = vpack.c.bf16 %v1155_v36, %v1155_v36 }
 0x546   : > { %v857_v9 = vcombine.low %v829_v4, %v836_v5  ;;  %v1857_v10 = vcombine.high %v829_v4, %v836_v5  ;;  %v873_v11 = vcombine.low %v845_v6, %v852_v7  ;;  %v1858_v12 = vcombine.high %v845_v6, %v852_v7 }
 0x548   : > { %v864_v13 = vrot.slane %v857_v9, %v2325_v37  ;;  %v872_v14 = vrot.slane %v1857_v10, %v2325_v37  ;;  %v880_v15 = vrot.slane %v873_v11, %v2325_v37  ;;  %v888_v16 = vrot.slane %v1858_v12, %v2325_v37 }
 0x54a   : > { %v889_v17 = vcombine.low %v864_v13, %v872_v14  ;;  %v890_v18 = vcombine.high %v864_v13, %v872_v14  ;;  %v905_v19 = vcombine.low %v880_v15, %v888_v16  ;;  %v906_v21 = vcombine.high %v880_v15, %v888_v16 }
 0x54c   : > { %v897_v22 = vrot.slane %v889_v17, %v2335_v47  ;;  %v904_v23 = vrot.slane %v890_v18, %v2335_v47  ;;  %v913_v28 = vrot.slane %v905_v19, %v2335_v47  ;;  %v920_v29 = vrot.slane %v906_v21, %v2335_v47  ;;  %v2056_v21 = vld [vmem:[%s2572_s4 + $0x8] sm:$0xff]  }
 0x54e   : > { %v921_v31 = vcombine.low %v897_v22, %v913_v28  ;;  %v922_v32 = vcombine.high %v897_v22, %v913_v28  ;;  %v923_v33 = vcombine.low %v904_v23, %v920_v29  ;;  %v924_v34 = vcombine.high %v904_v23, %v920_v29 }
 0x550   : > { %v925_v40 = vpack.c.bf16 %v921_v31, %v921_v31  ;;  %v926_v41 = vpack.c.bf16 %v922_v32, %v922_v32  ;;  %v927_v43 = vpack.c.bf16 %v923_v33, %v923_v33  ;;  %v928_v44 = vpack.c.bf16 %v924_v34, %v924_v34 }
 0x552   : > { %v1167_v20 = vsel %vm1165_vm3, %v925_v40, 0  ;;  %v1213_v42 = vsel %vm1165_vm3, %v926_v41, 0  ;;  %v1259_v38 = vsel %vm1165_vm3, %v927_v43, 0  ;;  %v1305_v39 = vsel %vm1165_vm3, %v928_v44, 0 }
 0x553   : > { %1951 = vmatpush3.bf16.msra.mxu1 %v1167_v20  ;;  %1957 = vmatpush3.bf16.msra.mxu0 %v1213_v42 }
 0x554   : > { %1962 = vmatprep.subr.bf16.mxu1 %v2151_v8  ;;  %1968 = vmatprep.subr.bf16.mxu0 %v2151_v8 }
 0x556   : > { %1953 = vmatmul.mubr.msk.bf16.vlgmr.msra.gmra.mrb[8].mxu1 %vm929_vm2, %v1158_v45  ;;  %1959 = vmatmul.mubr.msk.bf16.vlgmr.msra.gmra.mrb[12].mxu0 %vm929_vm2, %v1159_v46 }
 0x557   : > { %1963 = vmatpush3.bf16.msra.mxu1 %v1259_v38  ;;  %1969 = vmatpush3.bf16.msra.mxu0 %v1305_v39 }
 0x558   : > { %1964 = vmatprep.mubr.msk.bf16.mxu1 %vm2152_vm1, %v2151_v8  ;;  %1970 = vmatprep.mubr.msk.bf16.mxu0 %vm2152_vm1, %v2151_v8 }
 0x559   : > { %1974 = vmatprep.subr.bf16.mxu1 %v2151_v8  ;;  %1982 = vmatprep.subr.bf16.mxu0 %v2151_v8 }
 0x56b   : > { %v1146_v50 = vpop.xlane.xlu0 %1145 }
 0x56c   : > { %2077 = vrcp.f32 %v1146_v50 }
 0x56e   : > { %v1149_v25 = vpop.xlane.xlu1 %1148 }
 0x56f   : > { %2079 = vrcp.f32 %v1149_v25 }
 0x576   : > { %v2078_v24 = vpop.eup %2077 }
 0x577   : > { %v1156_v26 = vmul.f32 %v2078_v24, %v2401_v48 }
 0x579   : > { %v2080_v51 = vpop.eup %2079  ;;  %v1160_v52 = vpack.c.bf16 %v1156_v26, %v1156_v26 }
 0x57a   : > { %v1157_v53 = vmul.f32 %v2080_v51, %v2403_v49 }
 0x57b   : > { %1965 = vmatmul.mubr.msk.bf16.vlgmr.msra.gmra.mrb[12].mxu1 %vm929_vm2, %v1160_v52 }
 0x57c   : > { %v1161_v54 = vpack.c.bf16 %v1157_v53, %v1157_v53  ;;  %1978 = vmatprep.mubr.msk.bf16.mxu1 %vm2152_vm1, %v2151_v8  ;;  %1975 = vmatpush3.bf16.msra.mxu1 %v2055_v55 }
 0x57d   : > { %1976 = vmatprep.subr.bf16.mxu1 %v2151_v8 }
 0x57e   : > { %1971 = vmatmul.mubr.msk.bf16.vlgmr.msra.gmra.mrb[16].mxu0 %vm929_vm2, %v1161_v54 }
 0x57f   : > { %1986 = vmatprep.mubr.msk.bf16.mxu0 %vm2152_vm1, %v2151_v8 }
 0x580   : > { %1977 = vmatpush3.bf16.msra.mxu1 %v2056_v21 }
 0x581   : > { %1990 = vmatprep.subr.bf16.mxu1 %v2151_v8 }
 0x629   : > { %v1203_v48 = vpop.f32.mrb[8].mxu1  ;;  %v1249_v49 = vpop.f32.mrb[12].mxu0 }
 0x62a   : > { %v1954_v56 = vpop.f32.mrb[9].mxu1  ;;  %v1960_v57 = vpop.f32.mrb[13].mxu0 }
 0x62b   : > { %v1206_v58 = vpop.f32.mrb[10].mxu1  ;;  %v1252_v59 = vpop.f32.mrb[14].mxu0 }
 0x62c   : > { %v1955_v60 = vpop.f32.mrb[11].mxu1  ;;  %v1961_v61 = vpop.f32.mrb[15].mxu0 }
 0x64e   : > { %v1295_v62 = vpop.f32.mrb[12].mxu1 }
 0x64f   : > { %v1347_v63 = vcombine.low %v1203_v48, %v1295_v62  ;;  %v1348_v1 = vcombine.high %v1203_v48, %v1295_v62  ;;  %v1966_v2 = vpop.f32.mrb[13].mxu1 }
 0x650   : > { %v1298_v3 = vpop.f32.mrb[14].mxu1 }
 0x651   : > { %v1967_v4 = vpop.f32.mrb[15].mxu1  ;;  %v1341_v5 = vpop.f32.mrb[16].mxu0  ;;  %v1355_v11 = vrot.slane %v1347_v63, %v2325_v37  ;;  %v1362_v12 = vrot.slane %v1348_v1, %v2325_v37  ;;  %v2058_v63 = vld [vmem:[%s2575_s7 + $0x8] sm:$0xff]  }
 0x652   : > { %v1363_v6 = vcombine.low %v1249_v49, %v1341_v5  ;;  %v1364_v7 = vcombine.high %v1249_v49, %v1341_v5  ;;  %v1972_v9 = vpop.f32.mrb[17].mxu0  ;;  %v1872_v5 = vld [vmem:[%s2573_s5] ss:$0 sm:$0xff] }
 0x653   : > { %v1344_v10 = vpop.f32.mrb[18].mxu0 }
 0x654   : > { %v1371_v13 = vrot.slane %v1363_v6, %v2325_v37  ;;  %v1378_v14 = vrot.slane %v1364_v7, %v2325_v37  ;;  %v1973_v15 = vpop.f32.mrb[19].mxu0  ;;  %v1873_v7 = vld [vmem:[%s2574_s6] ss:$0 sm:$0xff] }
 0x655   : > { %v2062_v15 = vld [vmem:[%s2577_s9 + $0x18] sm:$0xff]  }
 0x656   : > { %v1379_v16 = vcombine.low %v1355_v11, %v1371_v13  ;;  %v1380_v17 = vcombine.high %v1355_v11, %v1371_v13  ;;  %v1395_v18 = vcombine.low %v1362_v12, %v1378_v14  ;;  %v1396_v19 = vcombine.high %v1362_v12, %v1378_v14  ;;  %v2059_v12 = vld [vmem:[%s2577_s9] sm:$0xff]   ;;  %v2060_v13 = vld [vmem:[%s2577_s9 + $0x8] sm:$0xff]   ;;  %v2061_v14 = vld [vmem:[%s2577_s9 + $0x10] sm:$0xff]  }
 0x658   : > { %v1387_v22 = vrot.slane %v1379_v16, %v2335_v47  ;;  %v1394_v23 = vrot.slane %v1380_v17, %v2335_v47  ;;  %v1403_v27 = vrot.slane %v1395_v18, %v2335_v47  ;;  %v1410_v28 = vrot.slane %v1396_v19, %v2335_v47  ;;  %v1874_v16 = vld [vmem:[%s2576_s8] ss:$0 sm:$0xff] }
 0x65a   : > { %v1415_v29 = vcombine.low %v1387_v22, %v1394_v23  ;;  %v1867_v30 = vcombine.high %v1387_v22, %v1394_v23  ;;  %v1431_v31 = vcombine.low %v1403_v27, %v1410_v28  ;;  %v1868_v32 = vcombine.high %v1403_v27, %v1410_v28 }
 0x65c   : > { %v1422_v33 = vrot.slane %v1415_v29, %v2325_v37  ;;  %v1430_v34 = vrot.slane %v1867_v30, %v2325_v37  ;;  %v1438_v35 = vrot.slane %v1431_v31, %v2325_v37  ;;  %v1446_v36 = vrot.slane %v1868_v32, %v2325_v37 }
 0x65e   : > { %v1448_v40 = vcombine.high %v1422_v33, %v1430_v34  ;;  %v1464_v41 = vcombine.high %v1438_v35, %v1446_v36  ;;  %v1447_v20 = vcombine.low %v1422_v33, %v1430_v34  ;;  %v1463_v42 = vcombine.low %v1438_v35, %v1446_v36 }
 0x660   : > { %v1462_v43 = vrot.slane %v1448_v40, %v2335_v47  ;;  %v1478_v44 = vrot.slane %v1464_v41, %v2335_v47  ;;  %v1455_v45 = vrot.slane %v1447_v20, %v2335_v47  ;;  %v1471_v46 = vrot.slane %v1463_v42, %v2335_v47 }
 0x662   : > { %v1481_v38 = vcombine.low %v1462_v43, %v1478_v44  ;;  %v1480_v39 = vcombine.high %v1455_v45, %v1471_v46  ;;  %v1482_v50 = vcombine.high %v1462_v43, %v1478_v44  ;;  %v1479_v25 = vcombine.low %v1455_v45, %v1471_v46 }
 0x664   : > { %1488 = vrot.lane.b32.xlu1 %v1481_v38, %s2160_s12  ;;  %1484 = vrot.lane.b32.xlu0 %v1480_v39, %s2161_s13  ;;  %s375_s13 = sand.u32 1, %s2141_s18   ;;  %s2525_s12 = scalar_lea.hbm %s2579_s11, %s1885_s22 }
 0x665   : > { %s1770_s21 = scalar_lea.sflag [#allocation3], %s375_s13 }
 0x668   : > { %1492 = vrot.lane.b32.xlu0 %v1482_v50, %s2162_s14  ;;  %s1846_s14 = sshll.u32 %s375_s13, 3 }
 0x669   : > { %s377_s24 = scalar_lea.vmem [#allocation2], %s1846_s14 }
 0x66a   : > { %s1783_s25 = sshll.u32 %s377_s24, 4  ;;  %s2527_s25 = int_to_ptr.vmem [resolvable:$true] %s1783_s25 }
 0x66b   : > { %s2087_s14 = scalar_lea.vmem %s2527_s25, 128  ;;  %p2094_p0 = scmp.lt.s32.totalorder %s2527_s25, %s2092_s16 }
 0x66c   : > { %p2088_p11 = scmp.ne.s32.totalorder %s2527_s25, %s2087_s14  ;;  %p2095_p1 = scmp.lt.s32.totalorder %s2093_s0, %s2087_s14 }
 0x66e   : > { %p2089_p12 = pnand %p2088_p11, %p2262_p5  ;;  %p2096_p2 = por %p2095_p1, %p2094_p0 }
 0x670   : > { %p2090_p13 = pneg %p2089_p12 }
 0x672   : > { %p2097_p3 = pnand %p2096_p2, %p2090_p13 }
 0x6d6   : > { %v1485_v37 = vpop.permute.xlu0 %1484  ;;  %v1489_v24 = vpop.permute.xlu1 %1488 }
 0x6d7   : > { %v1495_v26 = vsel %vm929_vm2, %v1479_v25, %v1485_v37 }
 0x6d8   : > { %v1497_v52 = vsel %vm1496_vm4, %v1495_v26, %v1489_v24  ;;  %v1878_v26 = vld [vmem:[%s2578_s10] ss:$0 sm:$0xff] }
 0x6da   : > { %v1493_v51 = vpop.permute.xlu0 %1492 }
 0x6db   : > { %v1499_v53 = vsel %vm1498_vm5, %v1497_v52, %v1493_v51 }
 0x6dc   : > { %v1500_v47 = vpack.c.bf16 %v1499_v53, %v1499_v53 }
 0x6de   : > { %1979 = vmatmul.mubr.msk.bf16.vlgmr.msra.gmra.mrb[16].mxu1 %vm386_vm0, %v1500_v47 }
 0x6df   : > { %1998 = vmatprep.mubr.msk.bf16.mxu1 %vm2152_vm1, %v2151_v8  ;;  %1991 = vmatpush3.bf16.msra.mxu1 %v2059_v12 }
 0x6e0   : > { %1992 = vmatprep.subr.bf16.mxu1 %v2151_v8 }
 0x6e3   : > { %1993 = vmatpush3.bf16.msra.mxu1 %v2060_v13 }
 0x6e4   : > { %1994 = vmatprep.subr.bf16.mxu1 %v2151_v8 }
 0x6e7   : > { %1995 = vmatpush3.bf16.msra.mxu1 %v2061_v14 }
 0x6e8   : > { %1996 = vmatprep.subr.bf16.mxu1 %v2151_v8 }
 0x6eb   : > { %1997 = vmatpush3.bf16.msra.mxu1 %v2062_v15 }
 0x7b1   : > { %v1554_v54 = vpop.f32.mrb[16].mxu1 }
 0x7b2   : > { %v2478_v55 = vadd.f32 %v1554_v54, %v2277_v0  ;;  %v1980_v48 = vpop.f32.mrb[17].mxu1  ;;  %v2057_v0 = vld [vmem:[%s2575_s7] sm:$0xff]  }
 0x7b3   : > { %v1557_v49 = vpop.f32.mrb[18].mxu1  ;;  %1983 = vmatpush3.bf16.msra.mxu0 %v2057_v0 }
 0x7b4   : > { %v1981_v56 = vpop.f32.mrb[19].mxu1  ;;  %v1562_v57 = vsel %vm386_vm0, %v2478_v55, 0.0  ;;  %1984 = vmatprep.subr.bf16.mxu0 %v2151_v8 }
 0x7b5   : > { %1563 = vadd.xlane.f32.xlu1 %v1562_v57 }
 0x7b7   : > { %1985 = vmatpush3.bf16.msra.mxu0 %v2058_v63 }
 0x842   : > { %v1564_v58 = vpop.xlane.xlu1 %1563 }
 0x843   : > { %v1565_v59 = vmul.f32 0.03125, %v1564_v58 }
 0x845   : > { %v1566_v60 = vsub.f32 %v2478_v55, %v1565_v59 }
 0x847   : > { %v1567_v61 = vmul.f32 %v1566_v60, %v1566_v60 }
 0x849   : > { %v1568_v62 = vsel %vm386_vm0, %v1567_v61, 0.0 }
 0x84a   : > { %1569 = vadd.xlane.f32.xlu0 %v1568_v62 }
 0x8d7   : > { %v1570_v1 = vpop.xlane.xlu0 %1569 }
 0x8d8   : > { %v1571_v2 = vmul.f32 0.03125, %v1570_v1 }
 0x8da   : > { %v1572_v3 = vadd.f32 1e-05, %v1571_v2 }
 0x8dc   : > { %2081 = vrsqrt.f32 %v1572_v3 }
 0x8e6   : > { %v2082_v4 = vpop.eup %2081 }
 0x8e7   : > { %v1574_v6 = vmul.f32 %v2082_v4, %v1566_v60 }
 0x8e9   : > { %v1581_v9 = vmul.f32 %v1872_v5, %v1574_v6 }
 0x8eb   : > { %v1588_v10 = vadd.f32 %v1873_v7, %v1581_v9 }
 0x8ed   : > { %v1589_v11 = vpack.c.bf16 %v1588_v10, %v1588_v10 }
 0x8ef   : > { %1987 = vmatmul.mubr.msk.bf16.vlgmr.msra.gmra.mrb[20].mxu0 %vm386_vm0, %v1589_v11 }
 0x9c2   : > { %v1650_v17 = vpop.f32.mrb[20].mxu0 }
 0x9c3   : > { %v1651_v18 = vadd.f32 %v1874_v16, %v1650_v17  ;;  %v1988_v19 = vpop.f32.mrb[21].mxu0 }
 0x9c4   : > { %v1653_v21 = vpop.f32.mrb[22].mxu0 }
 0x9c5   : > { %v1657_v22 = vmul.f32 0.70710677, %v1651_v18  ;;  %v1989_v23 = vpop.f32.mrb[23].mxu0  ;;  %v1656_v50 = vmul.f32 0.5, %v1651_v18 }
 0x9c7   : > { %v1658_v27 = vand.u32 2147483647, %v1657_v22  ;;  %vm1678_vm6 = vcmp.ge.f32.partialorder %v1657_v22, 0.0 }
 0x9c9   : > { %v1659_v28 = vmul.f32 0.3275911, %v1658_v27  ;;  %v1672_v8 = vsub.f32 0.0, %v1658_v27 }
 0x9cb   : > { %v1660_v29 = vadd.f32 1.0, %v1659_v28  ;;  %v1673_v31 = vmul.f32 %v1672_v8, %v1658_v27 }
 0x9cd   : > { %2083 = vrcp.f32 %v1660_v29  ;;  %v1674_v34 = vmul.f32 1.442695, %v1673_v31 }
 0x9cf   : > { %2085 = vpow2.f32 %v1674_v34 }
 0x9d7   : > { %v2084_v30 = vpop.eup %2083 }
 0x9d8   : > { %v1663_v32 = vmul.f32 1.0614054, %v2084_v30 }
 0x9d9   : > { %v2086_v44 = vpop.eup %2085 }
 0x9da   : > { %v1664_v33 = vadd.f32 -1.4531521, %v1663_v32 }
 0x9dc   : > { %v1665_v35 = vmul.f32 %v2084_v30, %v1664_v33 }
 0x9de   : > { %v1666_v36 = vadd.f32 1.4214138, %v1665_v35 }
 0x9e0   : > { %v1667_v40 = vmul.f32 %v2084_v30, %v1666_v36 }
 0x9e2   : > { %v1668_v41 = vadd.f32 -0.28449672, %v1667_v40 }
 0x9e4   : > { %v1669_v20 = vmul.f32 %v2084_v30, %v1668_v41 }
 0x9e6   : > { %v1670_v42 = vadd.f32 0.2548296, %v1669_v20 }
 0x9e8   : > { %v1671_v43 = vmul.f32 %v2084_v30, %v1670_v42 }
 0x9ea   : > { %v1676_v45 = vmul.f32 %v2086_v44, %v1671_v43 }
 0x9ec   : > { %v1677_v46 = vsub.f32 1.0, %v1676_v45 }
 0x9ee   : > { %v1679_v38 = vsub.f32 0.0, %v1677_v46 }
 0x9f0   : > { %v1680_v39 = vsel %vm1678_vm6, %v1677_v46, %v1679_v38 }
 0x9f1   : > { %v1681_v25 = vadd.f32 1.0, %v1680_v39 }
 0x9f3   : > { %v1682_v37 = vmul.f32 %v1681_v25, %v1656_v50 }
 0x9f5   : > { %v1683_v24 = vpack.c.bf16 %v1682_v37, %v1682_v37 }
 0x9f7   : > { %1999 = vmatmul.mubr.msk.bf16.vlgmr.msra.gmra.mrb[20].mxu1 %vm1723_vm7, %v1683_v24 }
 0xaca   : > { %v1761_v51 = vpop.f32.mrb[20].mxu1 }
 0xacb   : > { %v1762_v52 = vadd.f32 %v1878_v26, %v1761_v51  ;;  %v2000_v53 = vpop.f32.mrb[21].mxu1 }
 0xacc   : > { %v1764_v47 = vpop.f32.mrb[22].mxu1 }
 0xacd   : > { %v1767_v54 = vadd.f32 %v1762_v52, %v2478_v55  ;;  %v2001_v48 = vpop.f32.mrb[23].mxu1 }
 0xacf   : > { %1768 = vst.msk [vmem:[%s377_s24] sm:$0xff] %vm386_vm0, %v1767_v54 }
 0xad0   : > { %2100 = shalt.err (!%p2097_p3)
}
 0xad1   : > { %s2101_s13 = scalar_lea.hbm %s2525_s12, 128  ;;  %s2105_s29 = scalar_lea.hbm %s2579_s11, 256 }
 0xad2   : > { %p2102_p4 = scmp.ne.s32.totalorder %s2525_s12, %s2101_s13  ;;  %p2106_p9 = scmp.lt.u32.totalorder %s2525_s12, %s2579_s11 }
 0xad3   : > { %p2107_p10 = scmp.lt.u32.totalorder %s2105_s29, %s2101_s13  ;;  %p2109_p12 = scmp.lt.u32.totalorder %s2101_s13, %s2525_s12 }
 0xad4   : > { %p2103_p7 = pnand %p2102_p4, %p2262_p5 }
 0xad5   : > { %p2108_p11 = por %p2107_p10, %p2106_p9 }
 0xad6   : > { %p2104_p8 = pneg %p2103_p7 }
 0xad7   : > { %p2110_p13 = por %p2109_p12, %p2108_p11 }
 0xad9   : > { %p2111_p0 = pnand %p2110_p13, %p2104_p8 }
 0xadb   : > { %2114 = shalt.err (!%p2111_p0)
}
 0xadc   : > { %2002 = dma.vmem_to_hbm [thread:$0]  (%p2262_p5), %s2527_s25, 128, %s2525_s12, %s1770_s21  }
 0xadd PF: > { %p2008_p1 = scmp.ge.s32.totalorder %s2149_s20, 2  ;;  %s1795_s0 = sand.u32 1, %s2137_s17  }
 0xade   : > { %s1796_s14 = scalar_lea.sflag [#allocation3], %s1795_s0 }
 0xadf   : > { %p2005_p2 = pnand %p2008_p1, %p2266_p6 }
 0xae1   : > { %2132 = dma.done.wait (!%p2005_p2), %s1796_s14, 128  }
 0xae2   : > { %2134 = vsyncadd (!%p2005_p2), %s1796_s14, 4294967168  ;;  %p21_p3 = scmp.ge.s32.totalorder %s2249_s23, 4   ;;  %s2584_s17 = smov %s2141_s18 }
 0xae3   : > { %s2585_s18 = smov %s2145_s19  ;;  %s2586_s19 = smov %s2260_s26 }
 0xae4   : > { %s2587_s20 = smov %s2249_s23  ;;  %23 = sbr.rel (!%p21_p3) target bundleno = 5 (0x5), region = 99 }
 0xaeb   :  { %1801 = vsyncpa [#allocation3], 1 }
 0xaec   :  { %1803 = vsyncpa [#allocation3 + $0x1], 1 }

</bundles_post_ra>
